<compile_context>
chip_gen: v5e
topology: v5e:2x2
jax: 0.10.0
libtpu: 0.0.40
codegen_flags: <defaults>
</compile_context>

<pallas_src>
import math

import jax
import jax.numpy as jnp
from jax.experimental import pallas as pl
from jax.experimental.pallas import tpu as pltpu


# ---------------------------------------------------------------------------
# In-kernel building blocks
# ---------------------------------------------------------------------------
def _conv_bn_relu_pool(x, w_ref, scale_ref, bias_ref):
    """One Conv1d(k=3,s=1,p=1) + folded BN + ReLU + MaxPool1d(2) stage.

    x:         (L, Cin)  f32 activation held in registers.
    w_ref:     (3, Cin, Cout) conv taps (tap-major).
    scale_ref: (1, Cout) folded BN scale.
    bias_ref:  (1, Cout) folded (conv bias + BN) bias.
    returns:   (L // 2, Cout) f32.
    """
    l = x.shape[0]
    f32 = jnp.float32

    # Shifted, zero-padded conv operands via exact 0/1 row-gather matmuls.
    # Boundary zero padding (conv padding=1) falls out of the empty first/last
    # rows of the shift matrices, so no jnp.pad and no staging buffer.
    row = jax.lax.broadcasted_iota(jnp.int32, (l, l), 0)
    col = jax.lax.broadcasted_iota(jnp.int32, (l, l), 1)
    shift_m1 = (col == row - 1).astype(f32)  # (shift_m1 @ x)[i] = x[i-1], 0 at i=0
    shift_p1 = (col == row + 1).astype(f32)  # (shift_p1 @ x)[i] = x[i+1], 0 at i=L-1
    x_m1 = jnp.dot(shift_m1, x, preferred_element_type=f32)
    x_p1 = jnp.dot(shift_p1, x, preferred_element_type=f32)

    acc = jnp.dot(x_m1, w_ref[0], preferred_element_type=f32)
    acc = acc + jnp.dot(x, w_ref[1], preferred_element_type=f32)
    acc = acc + jnp.dot(x_p1, w_ref[2], preferred_element_type=f32)

    # Folded BatchNorm (+ conv bias) and ReLU.
    acc = jnp.maximum(acc * scale_ref[...] + bias_ref[...], 0.0)

    # MaxPool1d(kernel=2, stride=2): gather even/odd rows with exact 0/1
    # selection matmuls and take the elementwise max - fully in-register.
    lh = l // 2
    prow = jax.lax.broadcasted_iota(jnp.int32, (lh, l), 0)
    pcol = jax.lax.broadcasted_iota(jnp.int32, (lh, l), 1)
    sel_even = (pcol == 2 * prow).astype(f32)
    sel_odd = (pcol == 2 * prow + 1).astype(f32)
    return jnp.maximum(
        jnp.dot(sel_even, acc, preferred_element_type=f32),
        jnp.dot(sel_odd, acc, preferred_element_type=f32),
    )


def fused_cnn_kernel(
    x_ref,
    w1_ref, s1_ref, b1_ref,
    w2_ref, s2_ref, b2_ref,
    w3_ref, s3_ref, b3_ref,
    w4_ref, s4_ref, b4_ref,
    fcw_ref, fcb_ref,
    o_ref,
):
    """Whole CNN forward for one batch row; all intermediates stay on-chip."""
    x = x_ref[...]                                      # (128, 3)
    x = _conv_bn_relu_pool(x, w1_ref, s1_ref, b1_ref)   # (64, 16)
    x = _conv_bn_relu_pool(x, w2_ref, s2_ref, b2_ref)   # (32, 32)
    x = _conv_bn_relu_pool(x, w3_ref, s3_ref, b3_ref)   # (16, 64)
    x = _conv_bn_relu_pool(x, w4_ref, s4_ref, b4_ref)   # (8, 128)

    # Linear(1024, 5) epilogue. fcw_ref is (5, L=8, C=128), pre-permuted so
    # that fcw_ref[o, l, c] multiplies x[l, c]; PyTorch's channel-major flatten
    # is baked into the weight layout at build time (no runtime transpose).
    out_col = jax.lax.broadcasted_iota(jnp.int32, (1, 5), 1)
    logits = fcb_ref[...]                               # (1, 5)
    for o in range(5):                                  # static unroll: 5 outputs
        prod = x * fcw_ref[o]                           # (8, 128)
        s = jnp.sum(jnp.sum(prod, axis=1, keepdims=True), axis=0, keepdims=True)
        logits = logits + jnp.where(out_col == o, s, 0.0)
    o_ref[...] = logits


# ---------------------------------------------------------------------------
# Wrapper: one pallas_call for the whole network
# ---------------------------------------------------------------------------
def cnn_forward_impl(x_ncl, conv_params, fc_w, fc_b):
    b, cin, length = x_ncl.shape
    # Single tiny layout op for the whole forward: NCL -> NLC (channels->lanes).
    x_nlc = jnp.transpose(x_ncl, (0, 2, 1)).astype(jnp.float32)

    flat_inputs = [x_nlc]
    in_specs = [pl.BlockSpec((None, length, cin), lambda i: (i, 0, 0))]
    for w, scale, bias in conv_params:
        flat_inputs += [w, scale, bias]
        in_specs += [
            pl.BlockSpec(w.shape, lambda i: (0, 0, 0)),
            pl.BlockSpec(scale.shape, lambda i: (0, 0)),
            pl.BlockSpec(bias.shape, lambda i: (0, 0)),
        ]
    flat_inputs += [fc_w, fc_b]
    in_specs += [
        pl.BlockSpec(fc_w.shape, lambda i: (0, 0, 0)),
        pl.BlockSpec(fc_b.shape, lambda i: (0, 0)),
    ]

    out = pl.pallas_call(
        fused_cnn_kernel,
        out_shape=jax.ShapeDtypeStruct((b, 1, 5), jnp.float32),
        grid=(b,),
        in_specs=in_specs,
        out_specs=pl.BlockSpec((None, 1, 5), lambda i: (i, 0, 0)),
        compiler_params=pltpu.CompilerParams(
            # Batch-parallel: v7x's two TensorCores each take half the batch;
            # on v5e/v6e this is simply a short sequential loop.
            dimension_semantics=("parallel",)
        ),
    )(*flat_inputs)
    return out.reshape(b, 5)


cnn_forward = jax.jit(cnn_forward_impl)


# ---------------------------------------------------------------------------
# Parameters: synthetic init in PyTorch layouts, converted to kernel layouts
# ---------------------------------------------------------------------------
def make_params(key):
    chans = [3, 16, 32, 64, 128]
    eps = 1e-5
    stage_keys = jax.random.split(key, 5)
    conv_params = []
    for i in range(4):
        cin, cout = chans[i], chans[i + 1]
        k1, k2, k3, k4, k5, k6 = jax.random.split(stage_keys[i], 6)
        # PyTorch Conv1d weight layout: (Cout, Cin, K=3).
        w_torch = jax.random.normal(k1, (cout, cin, 3), jnp.float32) / math.sqrt(3 * cin)
        conv_b = jax.random.normal(k2, (cout,), jnp.float32) * 0.1
        gamma = 1.0 + 0.1 * jax.random.normal(k3, (cout,), jnp.float32)
        beta = 0.1 * jax.random.normal(k4, (cout,), jnp.float32)
        run_mean = 0.1 * jax.random.normal(k5, (cout,), jnp.float32)
        run_var = 1.0 + 0.5 * jax.random.uniform(k6, (cout,), jnp.float32)
        # Fold eval-mode BatchNorm (+ conv bias) into per-channel scale/bias.
        scale = gamma / jnp.sqrt(run_var + eps)
        bias = (conv_b - run_mean) * scale + beta
        # Kernel layout: tap-major (K=3, Cin, Cout).
        w_kio = jnp.transpose(w_torch, (2, 1, 0))
        conv_params.append((w_kio, scale.reshape(1, cout), bias.reshape(1, cout)))

    kf1, kf2 = jax.random.split(stage_keys[4], 2)
    # PyTorch Linear layout: (out=5, in=1024); input index is the channel-major
    # flatten c * 8 + l of the final (C=128, L=8) feature map.
    fc_w_torch = jax.random.normal(kf1, (5, 1024), jnp.float32) / math.sqrt(1024.0)
    fc_b = jax.random.normal(kf2, (5,), jnp.float32) * 0.1
    # Kernel layout: (5, L=8, C=128) so the NLC activation is consumed directly.
    fc_w = jnp.transpose(fc_w_torch.reshape(5, 128, 8), (0, 2, 1))
    return conv_params, fc_w, fc_b.reshape(1, 5)


if __name__ == "__main__":
    key = jax.random.PRNGKey(0)
    k_params, k_x = jax.random.split(key)
    conv_params, fc_w, fc_b = make_params(k_params)

    # Linear(1024, 5) after 4x MaxPool(2) with 128 final channels forces L=128.
    x = jax.random.normal(k_x, (2, 3, 128), jnp.float32)

    out = jax.block_until_ready(cnn_forward(x, conv_params, fc_w, fc_b))
    assert out.shape == (2, 5) and out.dtype == jnp.float32
    print("KERNEL_OK")
</pallas_src>

<mosaic_0001>
module attributes {stable_mosaic.version = 11 : i64} {
  func.func @fused_cnn_kernel(%arg0: i32, %arg1: memref<1x128x3xf32, #tpu.memory_space<vmem>>, %arg2: memref<3x3x16xf32, #tpu.memory_space<vmem>>, %arg3: memref<1x16xf32, #tpu.memory_space<vmem>>, %arg4: memref<1x16xf32, #tpu.memory_space<vmem>>, %arg5: memref<3x16x32xf32, #tpu.memory_space<vmem>>, %arg6: memref<1x32xf32, #tpu.memory_space<vmem>>, %arg7: memref<1x32xf32, #tpu.memory_space<vmem>>, %arg8: memref<3x32x64xf32, #tpu.memory_space<vmem>>, %arg9: memref<1x64xf32, #tpu.memory_space<vmem>>, %arg10: memref<1x64xf32, #tpu.memory_space<vmem>>, %arg11: memref<3x64x128xf32, #tpu.memory_space<vmem>>, %arg12: memref<1x128xf32, #tpu.memory_space<vmem>>, %arg13: memref<1x128xf32, #tpu.memory_space<vmem>>, %arg14: memref<5x8x128xf32, #tpu.memory_space<vmem>>, %arg15: memref<1x5xf32, #tpu.memory_space<vmem>>, %arg16: memref<1x1x5xf32, #tpu.memory_space<vmem>>) attributes {dimension_semantics = [#tpu.dimension_semantics<parallel>], iteration_bounds = array<i64: 2>, scalar_prefetch = 0 : i64, scratch_operands = 0 : i64, tpu.core_type = #tpu.core_type<tc>, window_params = [{transform_indices = @transform_0, window_bounds = array<i64: 1, 128, 3>}, {pipeline_mode = #tpu.pipeline_mode<synchronous>, transform_indices = @transform_1, window_bounds = array<i64: 3, 3, 16>}, {pipeline_mode = #tpu.pipeline_mode<synchronous>, transform_indices = @transform_2, window_bounds = array<i64: 1, 16>}, {pipeline_mode = #tpu.pipeline_mode<synchronous>, transform_indices = @transform_3, window_bounds = array<i64: 1, 16>}, {pipeline_mode = #tpu.pipeline_mode<synchronous>, transform_indices = @transform_4, window_bounds = array<i64: 3, 16, 32>}, {pipeline_mode = #tpu.pipeline_mode<synchronous>, transform_indices = @transform_5, window_bounds = array<i64: 1, 32>}, {pipeline_mode = #tpu.pipeline_mode<synchronous>, transform_indices = @transform_6, window_bounds = array<i64: 1, 32>}, {pipeline_mode = #tpu.pipeline_mode<synchronous>, transform_indices = @transform_7, window_bounds = array<i64: 3, 32, 64>}, {pipeline_mode = #tpu.pipeline_mode<synchronous>, transform_indices = @transform_8, window_bounds = array<i64: 1, 64>}, {pipeline_mode = #tpu.pipeline_mode<synchronous>, transform_indices = @transform_9, window_bounds = array<i64: 1, 64>}, {pipeline_mode = #tpu.pipeline_mode<synchronous>, transform_indices = @transform_10, window_bounds = array<i64: 3, 64, 128>}, {pipeline_mode = #tpu.pipeline_mode<synchronous>, transform_indices = @transform_11, window_bounds = array<i64: 1, 128>}, {pipeline_mode = #tpu.pipeline_mode<synchronous>, transform_indices = @transform_12, window_bounds = array<i64: 1, 128>}, {pipeline_mode = #tpu.pipeline_mode<synchronous>, transform_indices = @transform_13, window_bounds = array<i64: 5, 8, 128>}, {pipeline_mode = #tpu.pipeline_mode<synchronous>, transform_indices = @transform_14, window_bounds = array<i64: 1, 5>}, {transform_indices = @transform_15, window_bounds = array<i64: 1, 1, 5>}]} {
    %c0 = arith.constant 0 : index
    %c0_0 = arith.constant 0 : index
    %c0_1 = arith.constant 0 : index
    %0 = vector.load %arg1[%c0, %c0_0, %c0_1] : memref<1x128x3xf32, #tpu.memory_space<vmem>>, vector<1x128x3xf32>
    %1 = vector.shape_cast %0 : vector<1x128x3xf32> to vector<128x3xf32>
    %2 = tpu.iota {dimensions = array<i32: 0>} : vector<128x128xi32>
    %3 = tpu.iota {dimensions = array<i32: 1>} : vector<128x128xi32>
    %c1_i32 = arith.constant 1 : i32
    %4 = vector.broadcast %c1_i32 : i32 to vector<128x128xi32>
    %5 = arith.subi %2, %4 : vector<128x128xi32>
    %6 = arith.cmpi eq, %3, %5 : vector<128x128xi32>
    %7 = arith.extui %6 : vector<128x128xi1> to vector<128x128xi32>
    %8 = arith.sitofp %7 : vector<128x128xi32> to vector<128x128xf32>
    %c1_i32_2 = arith.constant 1 : i32
    %9 = vector.broadcast %c1_i32_2 : i32 to vector<128x128xi32>
    %10 = arith.addi %2, %9 : vector<128x128xi32>
    %11 = arith.cmpi eq, %3, %10 : vector<128x128xi32>
    %12 = arith.extui %11 : vector<128x128xi1> to vector<128x128xi32>
    %13 = arith.sitofp %12 : vector<128x128xi32> to vector<128x128xf32>
    %cst = arith.constant dense<0.000000e+00> : vector<128x3xf32>
    %14 = tpu.matmul %8, %1, %cst {dimension_numbers = #tpu.dot_dimension_numbers<[1], [0], [0], [1], [0, 0, 1, 1], [], []>} : vector<128x128xf32>, vector<128x3xf32>, vector<128x3xf32> -> vector<128x3xf32>
    %cst_3 = arith.constant dense<0.000000e+00> : vector<128x3xf32>
    %15 = tpu.matmul %13, %1, %cst_3 {dimension_numbers = #tpu.dot_dimension_numbers<[1], [0], [0], [1], [0, 0, 1, 1], [], []>} : vector<128x128xf32>, vector<128x3xf32>, vector<128x3xf32> -> vector<128x3xf32>
    %c0_4 = arith.constant 0 : index
    %c0_5 = arith.constant 0 : index
    %c0_6 = arith.constant 0 : index
    %16 = vector.load %arg2[%c0_4, %c0_5, %c0_6] : memref<3x3x16xf32, #tpu.memory_space<vmem>>, vector<1x3x16xf32>
    %17 = vector.shape_cast %16 : vector<1x3x16xf32> to vector<3x16xf32>
    %cst_7 = arith.constant dense<0.000000e+00> : vector<128x16xf32>
    %18 = tpu.matmul %14, %17, %cst_7 {dimension_numbers = #tpu.dot_dimension_numbers<[1], [0], [0], [1], [0, 0, 1, 1], [], []>} : vector<128x3xf32>, vector<3x16xf32>, vector<128x16xf32> -> vector<128x16xf32>
    %c1 = arith.constant 1 : index
    %c0_8 = arith.constant 0 : index
    %c0_9 = arith.constant 0 : index
    %19 = vector.load %arg2[%c1, %c0_8, %c0_9] : memref<3x3x16xf32, #tpu.memory_space<vmem>>, vector<1x3x16xf32>
    %20 = vector.shape_cast %19 : vector<1x3x16xf32> to vector<3x16xf32>
    %cst_10 = arith.constant dense<0.000000e+00> : vector<128x16xf32>
    %21 = tpu.matmul %1, %20, %cst_10 {dimension_numbers = #tpu.dot_dimension_numbers<[1], [0], [0], [1], [0, 0, 1, 1], [], []>} : vector<128x3xf32>, vector<3x16xf32>, vector<128x16xf32> -> vector<128x16xf32>
    %22 = arith.addf %18, %21 : vector<128x16xf32>
    %c2 = arith.constant 2 : index
    %c0_11 = arith.constant 0 : index
    %c0_12 = arith.constant 0 : index
    %23 = vector.load %arg2[%c2, %c0_11, %c0_12] : memref<3x3x16xf32, #tpu.memory_space<vmem>>, vector<1x3x16xf32>
    %24 = vector.shape_cast %23 : vector<1x3x16xf32> to vector<3x16xf32>
    %cst_13 = arith.constant dense<0.000000e+00> : vector<128x16xf32>
    %25 = tpu.matmul %15, %24, %cst_13 {dimension_numbers = #tpu.dot_dimension_numbers<[1], [0], [0], [1], [0, 0, 1, 1], [], []>} : vector<128x3xf32>, vector<3x16xf32>, vector<128x16xf32> -> vector<128x16xf32>
    %26 = arith.addf %22, %25 : vector<128x16xf32>
    %c0_14 = arith.constant 0 : index
    %c0_15 = arith.constant 0 : index
    %27 = vector.load %arg3[%c0_14, %c0_15] : memref<1x16xf32, #tpu.memory_space<vmem>>, vector<1x16xf32>
    %28 = vector.broadcast %27 : vector<1x16xf32> to vector<128x16xf32>
    %29 = arith.mulf %26, %28 : vector<128x16xf32>
    %c0_16 = arith.constant 0 : index
    %c0_17 = arith.constant 0 : index
    %30 = vector.load %arg4[%c0_16, %c0_17] : memref<1x16xf32, #tpu.memory_space<vmem>>, vector<1x16xf32>
    %31 = vector.broadcast %30 : vector<1x16xf32> to vector<128x16xf32>
    %32 = arith.addf %29, %31 : vector<128x16xf32>
    %cst_18 = arith.constant 0.000000e+00 : f32
    %33 = vector.broadcast %cst_18 : f32 to vector<128x16xf32>
    %34 = arith.maximumf %32, %33 : vector<128x16xf32>
    %35 = tpu.iota {dimensions = array<i32: 0>} : vector<64x128xi32>
    %36 = tpu.iota {dimensions = array<i32: 1>} : vector<64x128xi32>
    %c2_i32 = arith.constant 2 : i32
    %37 = vector.broadcast %c2_i32 : i32 to vector<64x128xi32>
    %38 = arith.muli %37, %35 : vector<64x128xi32>
    %39 = arith.cmpi eq, %36, %38 : vector<64x128xi32>
    %40 = arith.extui %39 : vector<64x128xi1> to vector<64x128xi32>
    %41 = arith.sitofp %40 : vector<64x128xi32> to vector<64x128xf32>
    %c2_i32_19 = arith.constant 2 : i32
    %42 = vector.broadcast %c2_i32_19 : i32 to vector<64x128xi32>
    %43 = arith.muli %42, %35 : vector<64x128xi32>
    %c1_i32_20 = arith.constant 1 : i32
    %44 = vector.broadcast %c1_i32_20 : i32 to vector<64x128xi32>
    %45 = arith.addi %43, %44 : vector<64x128xi32>
    %46 = arith.cmpi eq, %36, %45 : vector<64x128xi32>
    %47 = arith.extui %46 : vector<64x128xi1> to vector<64x128xi32>
    %48 = arith.sitofp %47 : vector<64x128xi32> to vector<64x128xf32>
    %cst_21 = arith.constant dense<0.000000e+00> : vector<64x16xf32>
    %49 = tpu.matmul %41, %34, %cst_21 {dimension_numbers = #tpu.dot_dimension_numbers<[1], [0], [0], [1], [0, 0, 1, 1], [], []>} : vector<64x128xf32>, vector<128x16xf32>, vector<64x16xf32> -> vector<64x16xf32>
    %cst_22 = arith.constant dense<0.000000e+00> : vector<64x16xf32>
    %50 = tpu.matmul %48, %34, %cst_22 {dimension_numbers = #tpu.dot_dimension_numbers<[1], [0], [0], [1], [0, 0, 1, 1], [], []>} : vector<64x128xf32>, vector<128x16xf32>, vector<64x16xf32> -> vector<64x16xf32>
    %51 = arith.maximumf %49, %50 : vector<64x16xf32>
    %52 = tpu.iota {dimensions = array<i32: 0>} : vector<64x64xi32>
    %53 = tpu.iota {dimensions = array<i32: 1>} : vector<64x64xi32>
    %c1_i32_23 = arith.constant 1 : i32
    %54 = vector.broadcast %c1_i32_23 : i32 to vector<64x64xi32>
    %55 = arith.subi %52, %54 : vector<64x64xi32>
    %56 = arith.cmpi eq, %53, %55 : vector<64x64xi32>
    %57 = arith.extui %56 : vector<64x64xi1> to vector<64x64xi32>
    %58 = arith.sitofp %57 : vector<64x64xi32> to vector<64x64xf32>
    %c1_i32_24 = arith.constant 1 : i32
    %59 = vector.broadcast %c1_i32_24 : i32 to vector<64x64xi32>
    %60 = arith.addi %52, %59 : vector<64x64xi32>
    %61 = arith.cmpi eq, %53, %60 : vector<64x64xi32>
    %62 = arith.extui %61 : vector<64x64xi1> to vector<64x64xi32>
    %63 = arith.sitofp %62 : vector<64x64xi32> to vector<64x64xf32>
    %cst_25 = arith.constant dense<0.000000e+00> : vector<64x16xf32>
    %64 = tpu.matmul %58, %51, %cst_25 {dimension_numbers = #tpu.dot_dimension_numbers<[1], [0], [0], [1], [0, 0, 1, 1], [], []>} : vector<64x64xf32>, vector<64x16xf32>, vector<64x16xf32> -> vector<64x16xf32>
    %cst_26 = arith.constant dense<0.000000e+00> : vector<64x16xf32>
    %65 = tpu.matmul %63, %51, %cst_26 {dimension_numbers = #tpu.dot_dimension_numbers<[1], [0], [0], [1], [0, 0, 1, 1], [], []>} : vector<64x64xf32>, vector<64x16xf32>, vector<64x16xf32> -> vector<64x16xf32>
    %c0_27 = arith.constant 0 : index
    %c0_28 = arith.constant 0 : index
    %c0_29 = arith.constant 0 : index
    %66 = vector.load %arg5[%c0_27, %c0_28, %c0_29] : memref<3x16x32xf32, #tpu.memory_space<vmem>>, vector<1x16x32xf32>
    %67 = vector.shape_cast %66 : vector<1x16x32xf32> to vector<16x32xf32>
    %cst_30 = arith.constant dense<0.000000e+00> : vector<64x32xf32>
    %68 = tpu.matmul %64, %67, %cst_30 {dimension_numbers = #tpu.dot_dimension_numbers<[1], [0], [0], [1], [0, 0, 1, 1], [], []>} : vector<64x16xf32>, vector<16x32xf32>, vector<64x32xf32> -> vector<64x32xf32>
    %c1_31 = arith.constant 1 : index
    %c0_32 = arith.constant 0 : index
    %c0_33 = arith.constant 0 : index
    %69 = vector.load %arg5[%c1_31, %c0_32, %c0_33] : memref<3x16x32xf32, #tpu.memory_space<vmem>>, vector<1x16x32xf32>
    %70 = vector.shape_cast %69 : vector<1x16x32xf32> to vector<16x32xf32>
    %cst_34 = arith.constant dense<0.000000e+00> : vector<64x32xf32>
    %71 = tpu.matmul %51, %70, %cst_34 {dimension_numbers = #tpu.dot_dimension_numbers<[1], [0], [0], [1], [0, 0, 1, 1], [], []>} : vector<64x16xf32>, vector<16x32xf32>, vector<64x32xf32> -> vector<64x32xf32>
    %72 = arith.addf %68, %71 : vector<64x32xf32>
    %c2_35 = arith.constant 2 : index
    %c0_36 = arith.constant 0 : index
    %c0_37 = arith.constant 0 : index
    %73 = vector.load %arg5[%c2_35, %c0_36, %c0_37] : memref<3x16x32xf32, #tpu.memory_space<vmem>>, vector<1x16x32xf32>
    %74 = vector.shape_cast %73 : vector<1x16x32xf32> to vector<16x32xf32>
    %cst_38 = arith.constant dense<0.000000e+00> : vector<64x32xf32>
    %75 = tpu.matmul %65, %74, %cst_38 {dimension_numbers = #tpu.dot_dimension_numbers<[1], [0], [0], [1], [0, 0, 1, 1], [], []>} : vector<64x16xf32>, vector<16x32xf32>, vector<64x32xf32> -> vector<64x32xf32>
    %76 = arith.addf %72, %75 : vector<64x32xf32>
    %c0_39 = arith.constant 0 : index
    %c0_40 = arith.constant 0 : index
    %77 = vector.load %arg6[%c0_39, %c0_40] : memref<1x32xf32, #tpu.memory_space<vmem>>, vector<1x32xf32>
    %78 = vector.broadcast %77 : vector<1x32xf32> to vector<64x32xf32>
    %79 = arith.mulf %76, %78 : vector<64x32xf32>
    %c0_41 = arith.constant 0 : index
    %c0_42 = arith.constant 0 : index
    %80 = vector.load %arg7[%c0_41, %c0_42] : memref<1x32xf32, #tpu.memory_space<vmem>>, vector<1x32xf32>
    %81 = vector.broadcast %80 : vector<1x32xf32> to vector<64x32xf32>
    %82 = arith.addf %79, %81 : vector<64x32xf32>
    %cst_43 = arith.constant 0.000000e+00 : f32
    %83 = vector.broadcast %cst_43 : f32 to vector<64x32xf32>
    %84 = arith.maximumf %82, %83 : vector<64x32xf32>
    %85 = tpu.iota {dimensions = array<i32: 0>} : vector<32x64xi32>
    %86 = tpu.iota {dimensions = array<i32: 1>} : vector<32x64xi32>
    %c2_i32_44 = arith.constant 2 : i32
    %87 = vector.broadcast %c2_i32_44 : i32 to vector<32x64xi32>
    %88 = arith.muli %87, %85 : vector<32x64xi32>
    %89 = arith.cmpi eq, %86, %88 : vector<32x64xi32>
    %90 = arith.extui %89 : vector<32x64xi1> to vector<32x64xi32>
    %91 = arith.sitofp %90 : vector<32x64xi32> to vector<32x64xf32>
    %c2_i32_45 = arith.constant 2 : i32
    %92 = vector.broadcast %c2_i32_45 : i32 to vector<32x64xi32>
    %93 = arith.muli %92, %85 : vector<32x64xi32>
    %c1_i32_46 = arith.constant 1 : i32
    %94 = vector.broadcast %c1_i32_46 : i32 to vector<32x64xi32>
    %95 = arith.addi %93, %94 : vector<32x64xi32>
    %96 = arith.cmpi eq, %86, %95 : vector<32x64xi32>
    %97 = arith.extui %96 : vector<32x64xi1> to vector<32x64xi32>
    %98 = arith.sitofp %97 : vector<32x64xi32> to vector<32x64xf32>
    %cst_47 = arith.constant dense<0.000000e+00> : vector<32x32xf32>
    %99 = tpu.matmul %91, %84, %cst_47 {dimension_numbers = #tpu.dot_dimension_numbers<[1], [0], [0], [1], [0, 0, 1, 1], [], []>} : vector<32x64xf32>, vector<64x32xf32>, vector<32x32xf32> -> vector<32x32xf32>
    %cst_48 = arith.constant dense<0.000000e+00> : vector<32x32xf32>
    %100 = tpu.matmul %98, %84, %cst_48 {dimension_numbers = #tpu.dot_dimension_numbers<[1], [0], [0], [1], [0, 0, 1, 1], [], []>} : vector<32x64xf32>, vector<64x32xf32>, vector<32x32xf32> -> vector<32x32xf32>
    %101 = arith.maximumf %99, %100 : vector<32x32xf32>
    %102 = tpu.iota {dimensions = array<i32: 0>} : vector<32x32xi32>
    %103 = tpu.iota {dimensions = array<i32: 1>} : vector<32x32xi32>
    %c1_i32_49 = arith.constant 1 : i32
    %104 = vector.broadcast %c1_i32_49 : i32 to vector<32x32xi32>
    %105 = arith.subi %102, %104 : vector<32x32xi32>
    %106 = arith.cmpi eq, %103, %105 : vector<32x32xi32>
    %107 = arith.extui %106 : vector<32x32xi1> to vector<32x32xi32>
    %108 = arith.sitofp %107 : vector<32x32xi32> to vector<32x32xf32>
    %c1_i32_50 = arith.constant 1 : i32
    %109 = vector.broadcast %c1_i32_50 : i32 to vector<32x32xi32>
    %110 = arith.addi %102, %109 : vector<32x32xi32>
    %111 = arith.cmpi eq, %103, %110 : vector<32x32xi32>
    %112 = arith.extui %111 : vector<32x32xi1> to vector<32x32xi32>
    %113 = arith.sitofp %112 : vector<32x32xi32> to vector<32x32xf32>
    %cst_51 = arith.constant dense<0.000000e+00> : vector<32x32xf32>
    %114 = tpu.matmul %108, %101, %cst_51 {dimension_numbers = #tpu.dot_dimension_numbers<[1], [0], [0], [1], [0, 0, 1, 1], [], []>} : vector<32x32xf32>, vector<32x32xf32>, vector<32x32xf32> -> vector<32x32xf32>
    %cst_52 = arith.constant dense<0.000000e+00> : vector<32x32xf32>
    %115 = tpu.matmul %113, %101, %cst_52 {dimension_numbers = #tpu.dot_dimension_numbers<[1], [0], [0], [1], [0, 0, 1, 1], [], []>} : vector<32x32xf32>, vector<32x32xf32>, vector<32x32xf32> -> vector<32x32xf32>
    %c0_53 = arith.constant 0 : index
    %c0_54 = arith.constant 0 : index
    %c0_55 = arith.constant 0 : index
    %116 = vector.load %arg8[%c0_53, %c0_54, %c0_55] : memref<3x32x64xf32, #tpu.memory_space<vmem>>, vector<1x32x64xf32>
    %117 = vector.shape_cast %116 : vector<1x32x64xf32> to vector<32x64xf32>
    %cst_56 = arith.constant dense<0.000000e+00> : vector<32x64xf32>
    %118 = tpu.matmul %114, %117, %cst_56 {dimension_numbers = #tpu.dot_dimension_numbers<[1], [0], [0], [1], [0, 0, 1, 1], [], []>} : vector<32x32xf32>, vector<32x64xf32>, vector<32x64xf32> -> vector<32x64xf32>
    %c1_57 = arith.constant 1 : index
    %c0_58 = arith.constant 0 : index
    %c0_59 = arith.constant 0 : index
    %119 = vector.load %arg8[%c1_57, %c0_58, %c0_59] : memref<3x32x64xf32, #tpu.memory_space<vmem>>, vector<1x32x64xf32>
    %120 = vector.shape_cast %119 : vector<1x32x64xf32> to vector<32x64xf32>
    %cst_60 = arith.constant dense<0.000000e+00> : vector<32x64xf32>
    %121 = tpu.matmul %101, %120, %cst_60 {dimension_numbers = #tpu.dot_dimension_numbers<[1], [0], [0], [1], [0, 0, 1, 1], [], []>} : vector<32x32xf32>, vector<32x64xf32>, vector<32x64xf32> -> vector<32x64xf32>
    %122 = arith.addf %118, %121 : vector<32x64xf32>
    %c2_61 = arith.constant 2 : index
    %c0_62 = arith.constant 0 : index
    %c0_63 = arith.constant 0 : index
    %123 = vector.load %arg8[%c2_61, %c0_62, %c0_63] : memref<3x32x64xf32, #tpu.memory_space<vmem>>, vector<1x32x64xf32>
    %124 = vector.shape_cast %123 : vector<1x32x64xf32> to vector<32x64xf32>
    %cst_64 = arith.constant dense<0.000000e+00> : vector<32x64xf32>
    %125 = tpu.matmul %115, %124, %cst_64 {dimension_numbers = #tpu.dot_dimension_numbers<[1], [0], [0], [1], [0, 0, 1, 1], [], []>} : vector<32x32xf32>, vector<32x64xf32>, vector<32x64xf32> -> vector<32x64xf32>
    %126 = arith.addf %122, %125 : vector<32x64xf32>
    %c0_65 = arith.constant 0 : index
    %c0_66 = arith.constant 0 : index
    %127 = vector.load %arg9[%c0_65, %c0_66] : memref<1x64xf32, #tpu.memory_space<vmem>>, vector<1x64xf32>
    %128 = vector.broadcast %127 : vector<1x64xf32> to vector<32x64xf32>
    %129 = arith.mulf %126, %128 : vector<32x64xf32>
    %c0_67 = arith.constant 0 : index
    %c0_68 = arith.constant 0 : index
    %130 = vector.load %arg10[%c0_67, %c0_68] : memref<1x64xf32, #tpu.memory_space<vmem>>, vector<1x64xf32>
    %131 = vector.broadcast %130 : vector<1x64xf32> to vector<32x64xf32>
    %132 = arith.addf %129, %131 : vector<32x64xf32>
    %cst_69 = arith.constant 0.000000e+00 : f32
    %133 = vector.broadcast %cst_69 : f32 to vector<32x64xf32>
    %134 = arith.maximumf %132, %133 : vector<32x64xf32>
    %135 = tpu.iota {dimensions = array<i32: 0>} : vector<16x32xi32>
    %136 = tpu.iota {dimensions = array<i32: 1>} : vector<16x32xi32>
    %c2_i32_70 = arith.constant 2 : i32
    %137 = vector.broadcast %c2_i32_70 : i32 to vector<16x32xi32>
    %138 = arith.muli %137, %135 : vector<16x32xi32>
    %139 = arith.cmpi eq, %136, %138 : vector<16x32xi32>
    %140 = arith.extui %139 : vector<16x32xi1> to vector<16x32xi32>
    %141 = arith.sitofp %140 : vector<16x32xi32> to vector<16x32xf32>
    %c2_i32_71 = arith.constant 2 : i32
    %142 = vector.broadcast %c2_i32_71 : i32 to vector<16x32xi32>
    %143 = arith.muli %142, %135 : vector<16x32xi32>
    %c1_i32_72 = arith.constant 1 : i32
    %144 = vector.broadcast %c1_i32_72 : i32 to vector<16x32xi32>
    %145 = arith.addi %143, %144 : vector<16x32xi32>
    %146 = arith.cmpi eq, %136, %145 : vector<16x32xi32>
    %147 = arith.extui %146 : vector<16x32xi1> to vector<16x32xi32>
    %148 = arith.sitofp %147 : vector<16x32xi32> to vector<16x32xf32>
    %cst_73 = arith.constant dense<0.000000e+00> : vector<16x64xf32>
    %149 = tpu.matmul %141, %134, %cst_73 {dimension_numbers = #tpu.dot_dimension_numbers<[1], [0], [0], [1], [0, 0, 1, 1], [], []>} : vector<16x32xf32>, vector<32x64xf32>, vector<16x64xf32> -> vector<16x64xf32>
    %cst_74 = arith.constant dense<0.000000e+00> : vector<16x64xf32>
    %150 = tpu.matmul %148, %134, %cst_74 {dimension_numbers = #tpu.dot_dimension_numbers<[1], [0], [0], [1], [0, 0, 1, 1], [], []>} : vector<16x32xf32>, vector<32x64xf32>, vector<16x64xf32> -> vector<16x64xf32>
    %151 = arith.maximumf %149, %150 : vector<16x64xf32>
    %152 = tpu.iota {dimensions = array<i32: 0>} : vector<16x16xi32>
    %153 = tpu.iota {dimensions = array<i32: 1>} : vector<16x16xi32>
    %c1_i32_75 = arith.constant 1 : i32
    %154 = vector.broadcast %c1_i32_75 : i32 to vector<16x16xi32>
    %155 = arith.subi %152, %154 : vector<16x16xi32>
    %156 = arith.cmpi eq, %153, %155 : vector<16x16xi32>
    %157 = arith.extui %156 : vector<16x16xi1> to vector<16x16xi32>
    %158 = arith.sitofp %157 : vector<16x16xi32> to vector<16x16xf32>
    %c1_i32_76 = arith.constant 1 : i32
    %159 = vector.broadcast %c1_i32_76 : i32 to vector<16x16xi32>
    %160 = arith.addi %152, %159 : vector<16x16xi32>
    %161 = arith.cmpi eq, %153, %160 : vector<16x16xi32>
    %162 = arith.extui %161 : vector<16x16xi1> to vector<16x16xi32>
    %163 = arith.sitofp %162 : vector<16x16xi32> to vector<16x16xf32>
    %cst_77 = arith.constant dense<0.000000e+00> : vector<16x64xf32>
    %164 = tpu.matmul %158, %151, %cst_77 {dimension_numbers = #tpu.dot_dimension_numbers<[1], [0], [0], [1], [0, 0, 1, 1], [], []>} : vector<16x16xf32>, vector<16x64xf32>, vector<16x64xf32> -> vector<16x64xf32>
    %cst_78 = arith.constant dense<0.000000e+00> : vector<16x64xf32>
    %165 = tpu.matmul %163, %151, %cst_78 {dimension_numbers = #tpu.dot_dimension_numbers<[1], [0], [0], [1], [0, 0, 1, 1], [], []>} : vector<16x16xf32>, vector<16x64xf32>, vector<16x64xf32> -> vector<16x64xf32>
    %c0_79 = arith.constant 0 : index
    %c0_80 = arith.constant 0 : index
    %c0_81 = arith.constant 0 : index
    %166 = vector.load %arg11[%c0_79, %c0_80, %c0_81] : memref<3x64x128xf32, #tpu.memory_space<vmem>>, vector<1x64x128xf32>
    %167 = vector.shape_cast %166 : vector<1x64x128xf32> to vector<64x128xf32>
    %cst_82 = arith.constant dense<0.000000e+00> : vector<16x128xf32>
    %168 = tpu.matmul %164, %167, %cst_82 {dimension_numbers = #tpu.dot_dimension_numbers<[1], [0], [0], [1], [0, 0, 1, 1], [], []>} : vector<16x64xf32>, vector<64x128xf32>, vector<16x128xf32> -> vector<16x128xf32>
    %c1_83 = arith.constant 1 : index
    %c0_84 = arith.constant 0 : index
    %c0_85 = arith.constant 0 : index
    %169 = vector.load %arg11[%c1_83, %c0_84, %c0_85] : memref<3x64x128xf32, #tpu.memory_space<vmem>>, vector<1x64x128xf32>
    %170 = vector.shape_cast %169 : vector<1x64x128xf32> to vector<64x128xf32>
    %cst_86 = arith.constant dense<0.000000e+00> : vector<16x128xf32>
    %171 = tpu.matmul %151, %170, %cst_86 {dimension_numbers = #tpu.dot_dimension_numbers<[1], [0], [0], [1], [0, 0, 1, 1], [], []>} : vector<16x64xf32>, vector<64x128xf32>, vector<16x128xf32> -> vector<16x128xf32>
    %172 = arith.addf %168, %171 : vector<16x128xf32>
    %c2_87 = arith.constant 2 : index
    %c0_88 = arith.constant 0 : index
    %c0_89 = arith.constant 0 : index
    %173 = vector.load %arg11[%c2_87, %c0_88, %c0_89] : memref<3x64x128xf32, #tpu.memory_space<vmem>>, vector<1x64x128xf32>
    %174 = vector.shape_cast %173 : vector<1x64x128xf32> to vector<64x128xf32>
    %cst_90 = arith.constant dense<0.000000e+00> : vector<16x128xf32>
    %175 = tpu.matmul %165, %174, %cst_90 {dimension_numbers = #tpu.dot_dimension_numbers<[1], [0], [0], [1], [0, 0, 1, 1], [], []>} : vector<16x64xf32>, vector<64x128xf32>, vector<16x128xf32> -> vector<16x128xf32>
    %176 = arith.addf %172, %175 : vector<16x128xf32>
    %c0_91 = arith.constant 0 : index
    %c0_92 = arith.constant 0 : index
    %177 = vector.load %arg12[%c0_91, %c0_92] : memref<1x128xf32, #tpu.memory_space<vmem>>, vector<1x128xf32>
    %178 = vector.broadcast %177 : vector<1x128xf32> to vector<16x128xf32>
    %179 = arith.mulf %176, %178 : vector<16x128xf32>
    %c0_93 = arith.constant 0 : index
    %c0_94 = arith.constant 0 : index
    %180 = vector.load %arg13[%c0_93, %c0_94] : memref<1x128xf32, #tpu.memory_space<vmem>>, vector<1x128xf32>
    %181 = vector.broadcast %180 : vector<1x128xf32> to vector<16x128xf32>
    %182 = arith.addf %179, %181 : vector<16x128xf32>
    %cst_95 = arith.constant 0.000000e+00 : f32
    %183 = vector.broadcast %cst_95 : f32 to vector<16x128xf32>
    %184 = arith.maximumf %182, %183 : vector<16x128xf32>
    %185 = tpu.iota {dimensions = array<i32: 0>} : vector<8x16xi32>
    %186 = tpu.iota {dimensions = array<i32: 1>} : vector<8x16xi32>
    %c2_i32_96 = arith.constant 2 : i32
    %187 = vector.broadcast %c2_i32_96 : i32 to vector<8x16xi32>
    %188 = arith.muli %187, %185 : vector<8x16xi32>
    %189 = arith.cmpi eq, %186, %188 : vector<8x16xi32>
    %190 = arith.extui %189 : vector<8x16xi1> to vector<8x16xi32>
    %191 = arith.sitofp %190 : vector<8x16xi32> to vector<8x16xf32>
    %c2_i32_97 = arith.constant 2 : i32
    %192 = vector.broadcast %c2_i32_97 : i32 to vector<8x16xi32>
    %193 = arith.muli %192, %185 : vector<8x16xi32>
    %c1_i32_98 = arith.constant 1 : i32
    %194 = vector.broadcast %c1_i32_98 : i32 to vector<8x16xi32>
    %195 = arith.addi %193, %194 : vector<8x16xi32>
    %196 = arith.cmpi eq, %186, %195 : vector<8x16xi32>
    %197 = arith.extui %196 : vector<8x16xi1> to vector<8x16xi32>
    %198 = arith.sitofp %197 : vector<8x16xi32> to vector<8x16xf32>
    %cst_99 = arith.constant dense<0.000000e+00> : vector<8x128xf32>
    %199 = tpu.matmul %191, %184, %cst_99 {dimension_numbers = #tpu.dot_dimension_numbers<[1], [0], [0], [1], [0, 0, 1, 1], [], []>} : vector<8x16xf32>, vector<16x128xf32>, vector<8x128xf32> -> vector<8x128xf32>
    %cst_100 = arith.constant dense<0.000000e+00> : vector<8x128xf32>
    %200 = tpu.matmul %198, %184, %cst_100 {dimension_numbers = #tpu.dot_dimension_numbers<[1], [0], [0], [1], [0, 0, 1, 1], [], []>} : vector<8x16xf32>, vector<16x128xf32>, vector<8x128xf32> -> vector<8x128xf32>
    %201 = arith.maximumf %199, %200 : vector<8x128xf32>
    %202 = tpu.iota {dimensions = array<i32: 1>} : vector<1x5xi32>
    %c0_101 = arith.constant 0 : index
    %c0_102 = arith.constant 0 : index
    %203 = vector.load %arg15[%c0_101, %c0_102] : memref<1x5xf32, #tpu.memory_space<vmem>>, vector<1x5xf32>
    %c0_103 = arith.constant 0 : index
    %c0_104 = arith.constant 0 : index
    %c0_105 = arith.constant 0 : index
    %204 = vector.load %arg14[%c0_103, %c0_104, %c0_105] : memref<5x8x128xf32, #tpu.memory_space<vmem>>, vector<1x8x128xf32>
    %205 = vector.shape_cast %204 : vector<1x8x128xf32> to vector<8x128xf32>
    %206 = arith.mulf %201, %205 : vector<8x128xf32>
    %cst_106 = arith.constant dense<0.000000e+00> : vector<8xf32>
    %207 = vector.multi_reduction <add>, %206, %cst_106 [1] : vector<8x128xf32> to vector<8xf32>
    %208 = vector.shape_cast %207 : vector<8xf32> to vector<8x1xf32>
    %cst_107 = arith.constant dense<0.000000e+00> : vector<1xf32>
    %209 = vector.multi_reduction <add>, %208, %cst_107 [0] : vector<8x1xf32> to vector<1xf32>
    %210 = vector.shape_cast %209 : vector<1xf32> to vector<1x1xf32>
    %c0_i32 = arith.constant 0 : i32
    %211 = vector.broadcast %c0_i32 : i32 to vector<1x5xi32>
    %212 = arith.cmpi eq, %202, %211 : vector<1x5xi32>
    %cst_108 = arith.constant 0.000000e+00 : f32
    %213 = vector.shape_cast %210 : vector<1x1xf32> to vector<1x1xf32>
    %214 = vector.broadcast %213 : vector<1x1xf32> to vector<1x5xf32>
    %215 = vector.broadcast %cst_108 : f32 to vector<1x5xf32>
    %216 = arith.select %212, %214, %215 : vector<1x5xi1>, vector<1x5xf32>
    %217 = arith.addf %203, %216 : vector<1x5xf32>
    %c1_109 = arith.constant 1 : index
    %c0_110 = arith.constant 0 : index
    %c0_111 = arith.constant 0 : index
    %218 = vector.load %arg14[%c1_109, %c0_110, %c0_111] : memref<5x8x128xf32, #tpu.memory_space<vmem>>, vector<1x8x128xf32>
    %219 = vector.shape_cast %218 : vector<1x8x128xf32> to vector<8x128xf32>
    %220 = arith.mulf %201, %219 : vector<8x128xf32>
    %cst_112 = arith.constant dense<0.000000e+00> : vector<8xf32>
    %221 = vector.multi_reduction <add>, %220, %cst_112 [1] : vector<8x128xf32> to vector<8xf32>
    %222 = vector.shape_cast %221 : vector<8xf32> to vector<8x1xf32>
    %cst_113 = arith.constant dense<0.000000e+00> : vector<1xf32>
    %223 = vector.multi_reduction <add>, %222, %cst_113 [0] : vector<8x1xf32> to vector<1xf32>
    %224 = vector.shape_cast %223 : vector<1xf32> to vector<1x1xf32>
    %c1_i32_114 = arith.constant 1 : i32
    %225 = vector.broadcast %c1_i32_114 : i32 to vector<1x5xi32>
    %226 = arith.cmpi eq, %202, %225 : vector<1x5xi32>
    %cst_115 = arith.constant 0.000000e+00 : f32
    %227 = vector.shape_cast %224 : vector<1x1xf32> to vector<1x1xf32>
    %228 = vector.broadcast %227 : vector<1x1xf32> to vector<1x5xf32>
    %229 = vector.broadcast %cst_115 : f32 to vector<1x5xf32>
    %230 = arith.select %226, %228, %229 : vector<1x5xi1>, vector<1x5xf32>
    %231 = arith.addf %217, %230 : vector<1x5xf32>
    %c2_116 = arith.constant 2 : index
    %c0_117 = arith.constant 0 : index
    %c0_118 = arith.constant 0 : index
    %232 = vector.load %arg14[%c2_116, %c0_117, %c0_118] : memref<5x8x128xf32, #tpu.memory_space<vmem>>, vector<1x8x128xf32>
    %233 = vector.shape_cast %232 : vector<1x8x128xf32> to vector<8x128xf32>
    %234 = arith.mulf %201, %233 : vector<8x128xf32>
    %cst_119 = arith.constant dense<0.000000e+00> : vector<8xf32>
    %235 = vector.multi_reduction <add>, %234, %cst_119 [1] : vector<8x128xf32> to vector<8xf32>
    %236 = vector.shape_cast %235 : vector<8xf32> to vector<8x1xf32>
    %cst_120 = arith.constant dense<0.000000e+00> : vector<1xf32>
    %237 = vector.multi_reduction <add>, %236, %cst_120 [0] : vector<8x1xf32> to vector<1xf32>
    %238 = vector.shape_cast %237 : vector<1xf32> to vector<1x1xf32>
    %c2_i32_121 = arith.constant 2 : i32
    %239 = vector.broadcast %c2_i32_121 : i32 to vector<1x5xi32>
    %240 = arith.cmpi eq, %202, %239 : vector<1x5xi32>
    %cst_122 = arith.constant 0.000000e+00 : f32
    %241 = vector.shape_cast %238 : vector<1x1xf32> to vector<1x1xf32>
    %242 = vector.broadcast %241 : vector<1x1xf32> to vector<1x5xf32>
    %243 = vector.broadcast %cst_122 : f32 to vector<1x5xf32>
    %244 = arith.select %240, %242, %243 : vector<1x5xi1>, vector<1x5xf32>
    %245 = arith.addf %231, %244 : vector<1x5xf32>
    %c3 = arith.constant 3 : index
    %c0_123 = arith.constant 0 : index
    %c0_124 = arith.constant 0 : index
    %246 = vector.load %arg14[%c3, %c0_123, %c0_124] : memref<5x8x128xf32, #tpu.memory_space<vmem>>, vector<1x8x128xf32>
    %247 = vector.shape_cast %246 : vector<1x8x128xf32> to vector<8x128xf32>
    %248 = arith.mulf %201, %247 : vector<8x128xf32>
    %cst_125 = arith.constant dense<0.000000e+00> : vector<8xf32>
    %249 = vector.multi_reduction <add>, %248, %cst_125 [1] : vector<8x128xf32> to vector<8xf32>
    %250 = vector.shape_cast %249 : vector<8xf32> to vector<8x1xf32>
    %cst_126 = arith.constant dense<0.000000e+00> : vector<1xf32>
    %251 = vector.multi_reduction <add>, %250, %cst_126 [0] : vector<8x1xf32> to vector<1xf32>
    %252 = vector.shape_cast %251 : vector<1xf32> to vector<1x1xf32>
    %c3_i32 = arith.constant 3 : i32
    %253 = vector.broadcast %c3_i32 : i32 to vector<1x5xi32>
    %254 = arith.cmpi eq, %202, %253 : vector<1x5xi32>
    %cst_127 = arith.constant 0.000000e+00 : f32
    %255 = vector.shape_cast %252 : vector<1x1xf32> to vector<1x1xf32>
    %256 = vector.broadcast %255 : vector<1x1xf32> to vector<1x5xf32>
    %257 = vector.broadcast %cst_127 : f32 to vector<1x5xf32>
    %258 = arith.select %254, %256, %257 : vector<1x5xi1>, vector<1x5xf32>
    %259 = arith.addf %245, %258 : vector<1x5xf32>
    %c4 = arith.constant 4 : index
    %c0_128 = arith.constant 0 : index
    %c0_129 = arith.constant 0 : index
    %260 = vector.load %arg14[%c4, %c0_128, %c0_129] : memref<5x8x128xf32, #tpu.memory_space<vmem>>, vector<1x8x128xf32>
    %261 = vector.shape_cast %260 : vector<1x8x128xf32> to vector<8x128xf32>
    %262 = arith.mulf %201, %261 : vector<8x128xf32>
    %cst_130 = arith.constant dense<0.000000e+00> : vector<8xf32>
    %263 = vector.multi_reduction <add>, %262, %cst_130 [1] : vector<8x128xf32> to vector<8xf32>
    %264 = vector.shape_cast %263 : vector<8xf32> to vector<8x1xf32>
    %cst_131 = arith.constant dense<0.000000e+00> : vector<1xf32>
    %265 = vector.multi_reduction <add>, %264, %cst_131 [0] : vector<8x1xf32> to vector<1xf32>
    %266 = vector.shape_cast %265 : vector<1xf32> to vector<1x1xf32>
    %c4_i32 = arith.constant 4 : i32
    %267 = vector.broadcast %c4_i32 : i32 to vector<1x5xi32>
    %268 = arith.cmpi eq, %202, %267 : vector<1x5xi32>
    %cst_132 = arith.constant 0.000000e+00 : f32
    %269 = vector.shape_cast %266 : vector<1x1xf32> to vector<1x1xf32>
    %270 = vector.broadcast %269 : vector<1x1xf32> to vector<1x5xf32>
    %271 = vector.broadcast %cst_132 : f32 to vector<1x5xf32>
    %272 = arith.select %268, %270, %271 : vector<1x5xi1>, vector<1x5xf32>
    %273 = arith.addf %259, %272 : vector<1x5xf32>
    %c0_133 = arith.constant 0 : index
    %c0_134 = arith.constant 0 : index
    %c0_135 = arith.constant 0 : index
    %274 = vector.load %arg16[%c0_133, %c0_134, %c0_135] : memref<1x1x5xf32, #tpu.memory_space<vmem>>, vector<1x1x5xf32>
    %275 = vector.shape_cast %274 : vector<1x1x5xf32> to vector<1x5xf32>
    %276 = vector.shape_cast %273 : vector<1x5xf32> to vector<1x1x5xf32>
    tpu.vector_store %arg16[%c0_133, %c0_134, %c0_135], %276 {strides = array<i32>} : memref<1x1x5xf32, #tpu.memory_space<vmem>>, vector<1x1x5xf32>,
    return
  }
  func.func @transform_0(%arg0: i32) -> (i32, i32, i32) {
    %c0_i32 = arith.constant 0 : i32
    %c0_i32_0 = arith.constant 0 : i32
    %c0_i32_1 = arith.constant 0 : i32
    return %arg0, %c0_i32, %c0_i32_0 : i32, i32, i32
  }
  func.func @transform_1(%arg0: i32) -> (i32, i32, i32) {
    %c0_i32 = arith.constant 0 : i32
    %c0_i32_0 = arith.constant 0 : i32
    %c0_i32_1 = arith.constant 0 : i32
    %c0_i32_2 = arith.constant 0 : i32
    return %c0_i32, %c0_i32_0, %c0_i32_1 : i32, i32, i32
  }
  func.func @transform_2(%arg0: i32) -> (i32, i32) {
    %c0_i32 = arith.constant 0 : i32
    %c0_i32_0 = arith.constant 0 : i32
    %c0_i32_1 = arith.constant 0 : i32
    return %c0_i32, %c0_i32_0 : i32, i32
  }
  func.func @transform_3(%arg0: i32) -> (i32, i32) {
    %c0_i32 = arith.constant 0 : i32
    %c0_i32_0 = arith.constant 0 : i32
    %c0_i32_1 = arith.constant 0 : i32
    return %c0_i32, %c0_i32_0 : i32, i32
  }
  func.func @transform_4(%arg0: i32) -> (i32, i32, i32) {
    %c0_i32 = arith.constant 0 : i32
    %c0_i32_0 = arith.constant 0 : i32
    %c0_i32_1 = arith.constant 0 : i32
    %c0_i32_2 = arith.constant 0 : i32
    return %c0_i32, %c0_i32_0, %c0_i32_1 : i32, i32, i32
  }
  func.func @transform_5(%arg0: i32) -> (i32, i32) {
    %c0_i32 = arith.constant 0 : i32
    %c0_i32_0 = arith.constant 0 : i32
    %c0_i32_1 = arith.constant 0 : i32
    return %c0_i32, %c0_i32_0 : i32, i32
  }
  func.func @transform_6(%arg0: i32) -> (i32, i32) {
    %c0_i32 = arith.constant 0 : i32
    %c0_i32_0 = arith.constant 0 : i32
    %c0_i32_1 = arith.constant 0 : i32
    return %c0_i32, %c0_i32_0 : i32, i32
  }
  func.func @transform_7(%arg0: i32) -> (i32, i32, i32) {
    %c0_i32 = arith.constant 0 : i32
    %c0_i32_0 = arith.constant 0 : i32
    %c0_i32_1 = arith.constant 0 : i32
    %c0_i32_2 = arith.constant 0 : i32
    return %c0_i32, %c0_i32_0, %c0_i32_1 : i32, i32, i32
  }
  func.func @transform_8(%arg0: i32) -> (i32, i32) {
    %c0_i32 = arith.constant 0 : i32
    %c0_i32_0 = arith.constant 0 : i32
    %c0_i32_1 = arith.constant 0 : i32
    return %c0_i32, %c0_i32_0 : i32, i32
  }
  func.func @transform_9(%arg0: i32) -> (i32, i32) {
    %c0_i32 = arith.constant 0 : i32
    %c0_i32_0 = arith.constant 0 : i32
    %c0_i32_1 = arith.constant 0 : i32
    return %c0_i32, %c0_i32_0 : i32, i32
  }
  func.func @transform_10(%arg0: i32) -> (i32, i32, i32) {
    %c0_i32 = arith.constant 0 : i32
    %c0_i32_0 = arith.constant 0 : i32
    %c0_i32_1 = arith.constant 0 : i32
    %c0_i32_2 = arith.constant 0 : i32
    return %c0_i32, %c0_i32_0, %c0_i32_1 : i32, i32, i32
  }
  func.func @transform_11(%arg0: i32) -> (i32, i32) {
    %c0_i32 = arith.constant 0 : i32
    %c0_i32_0 = arith.constant 0 : i32
    %c0_i32_1 = arith.constant 0 : i32
    return %c0_i32, %c0_i32_0 : i32, i32
  }
  func.func @transform_12(%arg0: i32) -> (i32, i32) {
    %c0_i32 = arith.constant 0 : i32
    %c0_i32_0 = arith.constant 0 : i32
    %c0_i32_1 = arith.constant 0 : i32
    return %c0_i32, %c0_i32_0 : i32, i32
  }
  func.func @transform_13(%arg0: i32) -> (i32, i32, i32) {
    %c0_i32 = arith.constant 0 : i32
    %c0_i32_0 = arith.constant 0 : i32
    %c0_i32_1 = arith.constant 0 : i32
    %c0_i32_2 = arith.constant 0 : i32
    return %c0_i32, %c0_i32_0, %c0_i32_1 : i32, i32, i32
  }
  func.func @transform_14(%arg0: i32) -> (i32, i32) {
    %c0_i32 = arith.constant 0 : i32
    %c0_i32_0 = arith.constant 0 : i32
    %c0_i32_1 = arith.constant 0 : i32
    return %c0_i32, %c0_i32_0 : i32, i32
  }
  func.func @transform_15(%arg0: i32) -> (i32, i32, i32) {
    %c0_i32 = arith.constant 0 : i32
    %c0_i32_0 = arith.constant 0 : i32
    %c0_i32_1 = arith.constant 0 : i32
    return %arg0, %c0_i32, %c0_i32_0 : i32, i32, i32
  }
}

</mosaic_0001>

<bundles_post_ra>
// kernel: cnn_forward_impl.1
= control target key start
LH: loop header
LB: loop body
LE: loop exit
PB: predicated region body
PF: predicated region fallthrough
CT: control target
= control target key end

     0   :  { %s4107_s0 = inlined_call_operand.vmem [shape: f32[2,128,3], index: 0, kind: input, shape index: {}]   ;;  %s4108_s1 = inlined_call_operand.vmem [shape: f32[3,3,16], index: 1, kind: input, shape index: {}]   ;;  %s4109_s2 = inlined_call_operand.vmem [shape: f32[1,16], index: 2, kind: input, shape index: {}]   ;;  %s4110_s3 = inlined_call_operand.vmem [shape: f32[1,16], index: 3, kind: input, shape index: {}]   ;;  %s4111_s4 = inlined_call_operand.vmem [shape: f32[3,16,32], index: 4, kind: input, shape index: {}]   ;;  %s4112_s5 = inlined_call_operand.vmem [shape: f32[1,32], index: 5, kind: input, shape index: {}]   ;;  %s4113_s6 = inlined_call_operand.vmem [shape: f32[1,32], index: 6, kind: input, shape index: {}]   ;;  %s4114_s7 = inlined_call_operand.hbm [shape: f32[3,32,64], index: 7, kind: input, shape index: {}]   ;;  %s4115_s8 = inlined_call_operand.vmem [shape: f32[1,64], index: 8, kind: input, shape index: {}]   ;;  %s4116_s9 = inlined_call_operand.vmem [shape: f32[1,64], index: 9, kind: input, shape index: {}]   ;;  %s4117_s10 = inlined_call_operand.vmem [shape: f32[3,64,128], index: 10, kind: input, shape index: {}]   ;;  %s4118_s11 = inlined_call_operand.vmem [shape: f32[1,128], index: 11, kind: input, shape index: {}]   ;;  %s4119_s12 = inlined_call_operand.vmem [shape: f32[1,128], index: 12, kind: input, shape index: {}]   ;;  %s4120_s13 = inlined_call_operand.hbm [shape: f32[5,8,128], index: 13, kind: input, shape index: {}]   ;;  %s4121_s14 = inlined_call_operand.vmem [shape: f32[1,5], index: 14, kind: input, shape index: {}]   ;;  %s4122_s15 = inlined_call_operand.hbm [shape: f32[2,1,5], index: 15, kind: output, shape index: {}]  }
   0x1   :  { %4166 = sst [smem:[#allocation38_spill]] %s4107_s0 }
   0x2   :  { %20 = vsyncpa [#allocation3], 0 }
   0x3   :  { %21 = vsyncpa [#allocation6], 0 }
   0x4   :  { %22 = vsyncpa [#allocation4], 0 }
   0x5   :  { %24 = vsyncpa [#allocation4 + $0x1], 0  ;;  %s3123_s18 = smov 0   ;;  %s3125_s19 = smov 0  }
   0x6   :  { %s3127_s20 = smov 0   ;;  %s3129_s21 = smov 0  }
   0x7 LB: > { %4167 = sst [smem:[#allocation11_spill]] %s3023_s18  ;;  %s3144_s22 = sadd.s32 4294967295, %s3035_s21   ;;  %s3035_s21 = sphi %s3129_s21, %s4245_s21   ;;  %s3031_s20 = sphi %s3127_s20, %s4247_s20   ;;  %s3027_s19 = sphi %s3125_s19, %s4249_s19   ;;  %s3023_s18 = sphi %s3123_s18, %s4248_s18  }
   0x8   : > { %4168 = sst [smem:[#allocation12_spill]] %s3031_s20  ;;  %s2543_s23 = sadd.s32 4294967294, %s3035_s21  }
   0x9   : > { %4169 = sst [smem:[#allocation13_spill]] %s3035_s21  ;;  %s3148_s24 = sadd.s32 1, %s3035_s21  }
   0xa   : > { %4170 = sst [smem:[#allocation14_spill]] %s3148_s24  ;;  %s357_s25 = sadd.s32 1, %s3031_s20 }
   0xb   : > { %s354_s26 = ssub.s32 %s3035_s21, %s3148_s24  ;;  %p367_p0 = scmp.ne.s32.totalorder %s3031_s20, %s3027_s19 }
   0xc   : > { %p355_p1 = scmp.eq.s32.totalorder %s354_s26, 0  ;;  %p368_p2 = scmp.eq.s32.totalorder %s3144_s22, 1 }
   0xd   : > { %p373_p3 = scmp.ne.s32.totalorder %s3027_s19, %s3023_s18  ;;  %p374_p4 = scmp.eq.s32.totalorder %s2543_s23, 1 }
   0xe   : > { %s3159_s27 = scalar_select %p355_p1, %s3031_s20, %s357_s25  }
   0xf   : > { %p3161_p5 = por %p368_p2, %p367_p0  ;;  %p3165_p6 = por %p374_p4, %p373_p3 }
  0x10   : > { %4171 = sst [smem:[#allocation15_spill]] %s3159_s27  ;;  %p2544_p7 = scmp.ge.s32.totalorder %s3035_s21, 1 }
  0x11   : > { %s4173_s29 = scalar_select %p3165_p6, 1, 0 }
  0x12   : > { %p381_p8 = scmp.lt.s32.totalorder %s3035_s21, 3  ;;  %p2854_p9 = scmp.eq.s32.totalorder %s3144_s22, 0 }
  0x13   : > { %4174 = sst [smem:[#allocation16_spill]] %s4173_s29  ;;  %s410_s23 = sshll.u32 %s4114_s7, 4  ;;  %s411_s23 = int_to_ptr.hbm [resolvable:$true] %s410_s23 }
  0x14   : > { %p3172_p10 = pnand %p2544_p7, %p381_p8  ;;  %s3037_s25 = smov [#allocation2]  }
  0x15   : > { %s412_s26 = sshll.u32 %s3037_s25, 4  ;;  %s439_s24 = sshll.u32 %s4120_s13, 4  ;;  %s413_s26 = int_to_ptr.vmem [resolvable:$true] %s412_s26  ;;  %s440_s24 = int_to_ptr.hbm [resolvable:$true] %s439_s24 }
  0x16   : > { %p2843_p11 = pneg %p3172_p10  ;;  %s3038_s29 = smov 128  }
  0x17   : > { %s3039_s18 = smov 8   ;;  %s3040_s21 = smov [#allocation5]  }
  0x18   : > { %p2844_p12 = pnand %p2854_p9, %p2843_p11  ;;  %s441_s16 = sshll.u32 %s3040_s21, 4  ;;  %s442_s16 = int_to_ptr.vmem [resolvable:$true] %s441_s16 }
  0x19   : > { %468 = sbr.rel (%p3172_p10) target bundleno = 2237 (0x8bd), region = 80 }
  0x1a   : > { %2846 = dma.hbm_to_vmem [thread:$0]  (!%p2844_p12), %s411_s23, 1536, %s413_s26, [#allocation3], %s3038_s29, %s3038_s29, %s3039_s18  }
  0x1b   : > { %2849 = dma.hbm_to_vmem [thread:$0]  (!%p2844_p12), %s440_s24, 640, %s442_s16, [#allocation6], %s3038_s29, %s3038_s29, %s3039_s18  }
  0x1e   : > { %3010 = dma.done.wait (%p2854_p9), [#allocation3], 1536  }
  0x1f   : > { %3012 = vsyncadd (%p2854_p9), [#allocation3], 4294965760 }
  0x20   : > { %3014 = dma.done.wait (%p2854_p9), [#allocation6], 640  }
  0x21   : > { %3016 = vsyncadd (%p2854_p9), [#allocation6], 4294966656  ;;  %p521_p13 = scmp.lt.s32.totalorder %s3144_s22, 1  ;;  %s4176_s0 = sld [smem:[#allocation38_spill]]  ;;  %vm871_vm0 = vcmask 1042432   ;;  %vm822_vm1 = vcmask 23552   ;;  %v542_v13 = vlaneseq }
  0x22   : > { %v2633_v6 = vld [vmem:[%s4108_s1 + $0x4] sm:$0x7]  ;;  %v4135_v23 = vmov 1.0   ;;  %v2668_v48 = vld [vmem:[%s4108_s1 + $0x8] sm:$0x7]  ;;  %s519_s29 = sand.u32 1, %s3027_s19   ;;  %s2462_s23 = scalar_lea.hbm %s4122_s15, %s3144_s22 }
  0x23   : > { %s522_s20 = scalar_select %p521_p13, %s3144_s22, 1  ;;  %2634 = vmatpush.msk.msra.mxu2 %vm871_vm0, %v2633_v6  ;;  %v3259_v16 = vshrl.u32 %v542_v13, 7  ;;  %v3264_v19 = vand.u32 127, %v542_v13  ;;  %v819_v60 = vld [vmem:[%s4108_s1] sm:$0x7] }
  0x24   : > { %2651 = vmatpush.msk.msra.mxu3 %vm871_vm0, %v819_v60  ;;  %s520_s25 = scalar_lea.vmem [#allocation7], %s519_s29  ;;  %s2466_s16 = sshll.u32 %s2462_s23, 4  ;;  %s2467_s16 = int_to_ptr.hbm [resolvable:$true] %s2466_s16 }
  0x25   : > { %s2824_s18 = sshll.u32 %s522_s20, 7  ;;  %v3267_v20 = vadd.s32 4294967295, %v3259_v16  ;;  %v3270_v21 = vadd.s32 1, %v3259_v16  ;;  %v3277_v22 = vadd.s32 8, %v3259_v16  ;;  %v3299_v26 = vadd.s32 16, %v3259_v16  ;;  %2669 = vmatpush.msk.msrb.mxu2 %vm871_vm0, %v2668_v48  ;;  %s2464_s26 = sshll.u32 %s520_s25, 4  ;;  %s2465_s26 = int_to_ptr.vmem [resolvable:$true] %s2464_s26 }
  0x26   : > { %v3321_v29 = vadd.s32 24, %v3259_v16  ;;  %v3343_v32 = vadd.s32 32, %v3259_v16  ;;  %v3365_v35 = vadd.s32 40, %v3259_v16  ;;  %v3388_v38 = vadd.s32 48, %v3259_v16  ;;  %s2454_s20 = scalar_lea.sflag [#allocation4], %s519_s29 }
  0x27   : > { %s3201_s27 = scalar_lea.vmem %s4176_s0, %s2824_s18  ;;  %4177 = vst [vmem:[#allocation17_spill] sm:$0xff] %v3267_v20  ;;  %vm577_vm2 = vcmp.eq.s32.totalorder %v3264_v19, %v3267_v20  ;;  %vm641_vm3 = vcmp.eq.s32.totalorder %v3264_v19, %v3270_v21  ;;  %v3288_v24 = vadd.s32 4294967295, %v3277_v22  ;;  %v3291_v25 = vadd.s32 1, %v3277_v22  ;;  %s2979_s18 = sshra.s32 %s2467_s16, 4  ;;  %s2980_s18 = int_to_ptr.hbm [resolvable:$true] %s2979_s18 }
  0x28   : > { %v3204_v0 = vld [vmem:[%s3201_s27 + $0x78] sm:$0xff]  ;;  %v3207_v1 = vld [vmem:[%s3201_s27 + $0x70] sm:$0xff]  ;;  %v3212_v2 = vld [vmem:[%s3201_s27 + $0x68] sm:$0xff]  ;;  %4178 = vst [vmem:[#allocation18_spill] sm:$0xff] %v3270_v21  ;;  %v3310_v27 = vadd.s32 4294967295, %v3299_v26  ;;  %v3313_v28 = vadd.s32 1, %v3299_v26  ;;  %p2986_p3 = scmp.lt.s32.totalorder %s2980_s18, %s4122_s15 }
  0x29   : > { %689 = vmatpush.msra.mxu0 %v3204_v0  ;;  %754 = vmatpush.msra.mxu1 %v3204_v0  ;;  %v3217_v3 = vld [vmem:[%s3201_s27 + $0x60] sm:$0xff]  ;;  %v3220_v4 = vld [vmem:[%s3201_s27 + $0x58] sm:$0xff]  ;;  %v3232_v7 = vld [vmem:[%s3201_s27 + $0x50] sm:$0xff]  ;;  %4179 = vst [vmem:[#allocation19_spill] sm:$0xff] %v3288_v24  ;;  %vm578_vm4 = vcmp.eq.s32.totalorder %v3264_v19, %v3288_v24  ;;  %vm642_vm5 = vcmp.eq.s32.totalorder %v3264_v19, %v3291_v25  ;;  %v3332_v30 = vadd.s32 4294967295, %v3321_v29  ;;  %v3335_v31 = vadd.s32 1, %v3321_v29 }
  0x2a   : > { %v526_v5 = vld [vmem:[%s3201_s27] sm:$0xff]  ;;  %v3238_v8 = vld [vmem:[%s3201_s27 + $0x48] sm:$0xff]  ;;  %v3248_v10 = vld [vmem:[%s3201_s27 + $0x38] sm:$0xff]  ;;  %4180 = vst [vmem:[#allocation20_spill] sm:$0xff] %v3291_v25  ;;  %vm579_vm6 = vcmp.eq.s32.totalorder %v3264_v19, %v3310_v27  ;;  %vm643_vm7 = vcmp.eq.s32.totalorder %v3264_v19, %v3313_v28  ;;  %v3354_v33 = vadd.s32 4294967295, %v3343_v32  ;;  %v3357_v34 = vadd.s32 1, %v3343_v32 }
  0x2b   : > { %690 = vmatpush.msra.mxu0 %v3207_v1  ;;  %755 = vmatpush.msra.mxu1 %v3207_v1  ;;  %v3243_v9 = vld [vmem:[%s3201_s27 + $0x40] sm:$0xff]  ;;  %v527_v11 = vld [vmem:[%s3201_s27 + $0x8] sm:$0xff]  ;;  %v532_v12 = vld [vmem:[%s3201_s27 + $0x30] sm:$0xff]  ;;  %4181 = vst [vmem:[#allocation21_spill] sm:$0xff] %v3310_v27  ;;  %vm4163_vm8 = vcmp.eq.s32.totalorder %v3264_v19, %v3332_v30  ;;  %vm4165_vm9 = vcmp.eq.s32.totalorder %v3264_v19, %v3335_v31  ;;  %v3376_v36 = vadd.s32 4294967295, %v3365_v35  ;;  %v3379_v37 = vadd.s32 1, %v3365_v35 }
  0x2c   : > { %2635 = vmatmul.msk.f32.vlgmr.msra.gmra.mxu2 %vm822_vm1, %v526_v5  ;;  %v531_v14 = vld [vmem:[%s3201_s27 + $0x28] sm:$0xff]  ;;  %v530_v15 = vld [vmem:[%s3201_s27 + $0x20] sm:$0xff]  ;;  %v529_v17 = vld [vmem:[%s3201_s27 + $0x18] sm:$0xff]  ;;  %4182 = vst [vmem:[#allocation22_spill] sm:$0xff] %v3313_v28  ;;  %vm4161_vm10 = vcmp.eq.s32.totalorder %v3264_v19, %v3354_v33  ;;  %vm4162_vm11 = vcmp.eq.s32.totalorder %v3264_v19, %v3357_v34  ;;  %v3399_v39 = vadd.s32 4294967295, %v3388_v38  ;;  %v3402_v40 = vadd.s32 1, %v3388_v38 }
  0x2d   : > { %691 = vmatpush.msra.mxu0 %v3212_v2  ;;  %756 = vmatpush.msra.mxu1 %v3212_v2  ;;  %v528_v18 = vld [vmem:[%s3201_s27 + $0x10] sm:$0xff]  ;;  %4183 = vst [vmem:[#allocation23_spill] sm:$0xff] %v3321_v29  ;;  %vm4129_vm12 = vcmp.eq.s32.totalorder %v3264_v19, %v3376_v36  ;;  %vm4132_vm13 = vcmp.eq.s32.totalorder %v3264_v19, %v3379_v37  ;;  %v3411_v41 = vadd.s32 56, %v3259_v16  ;;  %v551_v44 = vadd.s32 64, %v3259_v16  ;;  %v3580_v25 = vld [vmem:[%s4109_s2] ss:$0 sm:$0xff] }
  0x2e   : > { %4184 = vst [vmem:[#allocation24_spill] sm:$0xff] %v3332_v30  ;;  %vm4130_vm14 = vcmp.eq.s32.totalorder %v3264_v19, %v3399_v39  ;;  %vm4131_vm15 = vcmp.eq.s32.totalorder %v3264_v19, %v3402_v40  ;;  %v552_v47 = vadd.s32 72, %v3259_v16  ;;  %v553_v51 = vadd.s32 80, %v3259_v16  ;;  %s2981_s22 = scalar_lea.hbm %s2980_s18, 1  ;;  %s2985_s27 = scalar_lea.hbm %s4122_s15, 2 }
  0x2f   : > { %692 = vmatpush.msra.mxu0 %v3217_v3  ;;  %757 = vmatpush.msra.mxu1 %v3217_v3  ;;  %4185 = vst [vmem:[#allocation25_spill] sm:$0xff] %v3335_v31  ;;  %v3422_v42 = vadd.s32 4294967295, %v3411_v41  ;;  %v3425_v43 = vadd.s32 1, %v3411_v41  ;;  %v2561_v45 = vadd.s32 4294967295, %v551_v44  ;;  %v633_v46 = vadd.s32 1, %v551_v44  ;;  %p2982_p0 = scmp.ne.s32.totalorder %s2980_s18, %s2981_s22  ;;  %p2987_p4 = scmp.lt.s32.totalorder %s2985_s27, %s2981_s22 }
  0x30   : > { %4186 = vst [vmem:[#allocation26_spill] sm:$0xff] %v3343_v32  ;;  %v2562_v49 = vadd.s32 4294967295, %v552_v47  ;;  %v634_v50 = vadd.s32 1, %v552_v47  ;;  %v2563_v52 = vadd.s32 4294967295, %v553_v51  ;;  %v635_v53 = vadd.s32 1, %v553_v51 }
  0x31   : > { %693 = vmatpush.msra.mxu0 %v3220_v4  ;;  %758 = vmatpush.msra.mxu1 %v3220_v4  ;;  %4187 = vst [vmem:[#allocation27_spill] sm:$0xff] %v3354_v33  ;;  %v554_v54 = vadd.s32 88, %v3259_v16  ;;  %v555_v57 = vadd.s32 96, %v3259_v16  ;;  %v556_v61 = vadd.s32 104, %v3259_v16  ;;  %p2983_p1 = pnand %p2982_p0, %p3161_p5  ;;  %p2988_p7 = por %p2987_p4, %p2986_p3 }
  0x32   : > { %4188 = vst [vmem:[#allocation28_spill] sm:$0xff] %v3357_v34 }
  0x33   : > { %694 = vmatpush.msra.mxu0 %v3232_v7  ;;  %759 = vmatpush.msra.mxu1 %v3232_v7  ;;  %4189 = vst [vmem:[#allocation29_spill] sm:$0xff] %v3365_v35  ;;  %v2564_v55 = vadd.s32 4294967295, %v554_v54  ;;  %v636_v56 = vadd.s32 1, %v554_v54  ;;  %v2565_v58 = vadd.s32 4294967295, %v555_v57  ;;  %v637_v59 = vadd.s32 1, %v555_v57  ;;  %p2984_p2 = pneg %p2983_p1 }
  0x34   : > { %2636 = vmatmul.msk.f32.gmra.mxu2 %vm822_vm1, %v527_v11  ;;  %4190 = vst [vmem:[#allocation30_spill] sm:$0xff] %v3376_v36  ;;  %v2566_v62 = vadd.s32 4294967295, %v556_v61  ;;  %v638_v63 = vadd.s32 1, %v556_v61 }
  0x35   : > { %695 = vmatpush.msra.mxu0 %v3238_v8  ;;  %760 = vmatpush.msra.mxu1 %v3238_v8  ;;  %4191 = vst [vmem:[#allocation31_spill] sm:$0xff] %v3379_v37  ;;  %p2989_p8 = pnand %p2988_p7, %p2984_p2 }
  0x36   : > { %4192 = vst [vmem:[#allocation32_spill] sm:$0xff] %v3388_v38 }
  0x37   : > { %696 = vmatpush.msra.mxu0 %v3243_v9  ;;  %761 = vmatpush.msra.mxu1 %v3243_v9  ;;  %4193 = vst [vmem:[#allocation33_spill] sm:$0xff] %v3399_v39 }
  0x38   : > { %4194 = vst [vmem:[#allocation34_spill] sm:$0xff] %v3402_v40 }
  0x39   : > { %697 = vmatpush.msra.mxu0 %v3248_v10  ;;  %762 = vmatpush.msra.mxu1 %v3248_v10  ;;  %4195 = vst [vmem:[#allocation35_spill] sm:$0xff] %v3411_v41 }
  0x3a   : > { %4196 = vst [vmem:[#allocation36_spill] sm:$0xff] %v3422_v42 }
  0x3b   : > { %698 = vmatpush.msra.mxu0 %v532_v12  ;;  %763 = vmatpush.msra.mxu1 %v532_v12  ;;  %4197 = vst [vmem:[#allocation37_spill] sm:$0xff] %v3425_v43 }
  0x3c   : > { %2637 = vmatmul.msk.f32.gmra.mxu2 %vm822_vm1, %v528_v18 }
  0x3d   : > { %699 = vmatpush.msra.mxu0 %v531_v14  ;;  %764 = vmatpush.msra.mxu1 %v531_v14 }
  0x3f   : > { %700 = vmatpush.msra.mxu0 %v530_v15  ;;  %765 = vmatpush.msra.mxu1 %v530_v15 }
  0x41   : > { %701 = vmatpush.msra.mxu0 %v529_v17  ;;  %766 = vmatpush.msra.mxu1 %v529_v17 }
  0x43   : > { %702 = vmatpush.msra.mxu0 %v528_v18  ;;  %767 = vmatpush.msra.mxu1 %v528_v18 }
  0x44   : > { %2638 = vmatmul.msk.f32.gmra.mxu2 %vm822_vm1, %v529_v17 }
  0x45   : > { %703 = vmatpush.msra.mxu0 %v527_v11  ;;  %768 = vmatpush.msra.mxu1 %v527_v11 }
  0x47   : > { %704 = vmatpush.msra.mxu0 %v526_v5  ;;  %769 = vmatpush.msra.mxu1 %v526_v5 }
  0x48   : > { %2601 = vmatmul.msk.f32.vlgmr.msra.gmra.mxu0 %vm577_vm2, %v4135_v23  ;;  %2617 = vmatmul.msk.f32.vlgmr.msra.gmra.mxu1 %vm641_vm3, %v4135_v23 }
  0x4c   : > { %2639 = vmatmul.msk.f32.gmra.mxu2 %vm822_vm1, %v530_v15 }
  0x50   : > { %2602 = vmatmul.msk.f32.gmra.mxu0 %vm578_vm4, %v4135_v23  ;;  %2618 = vmatmul.msk.f32.gmra.mxu1 %vm642_vm5, %v4135_v23 }
  0x54   : > { %2640 = vmatmul.msk.f32.gmra.mxu2 %vm822_vm1, %v531_v14 }
  0x58   : > { %2603 = vmatmul.msk.f32.gmra.mxu0 %vm579_vm6, %v4135_v23  ;;  %2619 = vmatmul.msk.f32.gmra.mxu1 %vm643_vm7, %v4135_v23 }
  0x5c   : > { %2641 = vmatmul.msk.f32.gmra.mxu2 %vm822_vm1, %v532_v12 }
  0x60   : > { %2604 = vmatmul.msk.f32.gmra.mxu0 %vm4163_vm8, %v4135_v23  ;;  %2620 = vmatmul.msk.f32.gmra.mxu1 %vm4165_vm9, %v4135_v23 }
  0x64   : > { %2642 = vmatmul.msk.f32.gmra.mxu2 %vm822_vm1, %v3248_v10 }
  0x68   : > { %2605 = vmatmul.msk.f32.gmra.mxu0 %vm4161_vm10, %v4135_v23  ;;  %2621 = vmatmul.msk.f32.gmra.mxu1 %vm4162_vm11, %v4135_v23 }
  0x6c   : > { %2643 = vmatmul.msk.f32.gmra.mxu2 %vm822_vm1, %v3243_v9 }
  0x70   : > { %2606 = vmatmul.msk.f32.gmra.mxu0 %vm4129_vm12, %v4135_v23  ;;  %2622 = vmatmul.msk.f32.gmra.mxu1 %vm4132_vm13, %v4135_v23  ;;  %vm4133_vm12 = vcmp.eq.s32.totalorder %v3264_v19, %v3422_v42  ;;  %vm649_vm13 = vcmp.eq.s32.totalorder %v3264_v19, %v633_v46 }
  0x74   : > { %2644 = vmatmul.msk.f32.gmra.mxu2 %vm822_vm1, %v3238_v8 }
  0x78   : > { %2607 = vmatmul.msk.f32.gmra.mxu0 %vm4130_vm14, %v4135_v23  ;;  %2623 = vmatmul.msk.f32.gmra.mxu1 %vm4131_vm15, %v4135_v23  ;;  %vm4134_vm14 = vcmp.eq.s32.totalorder %v3264_v19, %v3425_v43  ;;  %vm585_vm15 = vcmp.eq.s32.totalorder %v3264_v19, %v2561_v45 }
  0x7c   : > { %2645 = vmatmul.msk.f32.gmra.mxu2 %vm822_vm1, %v3232_v7 }
  0x80   : > { %2608 = vmatmul.msk.f32.gmra.mxu0 %vm4133_vm12, %v4135_v23  ;;  %2624 = vmatmul.msk.f32.gmra.mxu1 %vm4134_vm14, %v4135_v23  ;;  %vm586_vm12 = vcmp.eq.s32.totalorder %v3264_v19, %v2562_v49  ;;  %vm650_vm14 = vcmp.eq.s32.totalorder %v3264_v19, %v634_v50 }
  0x84   : > { %2646 = vmatmul.msk.f32.gmra.mxu2 %vm822_vm1, %v3220_v4 }
  0x88   : > { %2609 = vmatmul.msk.f32.gmra.mxu0 %vm585_vm15, %v4135_v23  ;;  %2625 = vmatmul.msk.f32.gmra.mxu1 %vm649_vm13, %v4135_v23  ;;  %vm587_vm13 = vcmp.eq.s32.totalorder %v3264_v19, %v2563_v52  ;;  %vm651_vm15 = vcmp.eq.s32.totalorder %v3264_v19, %v635_v53 }
  0x8c   : > { %2647 = vmatmul.msk.f32.gmra.mxu2 %vm822_vm1, %v3217_v3 }
  0x90   : > { %2610 = vmatmul.msk.f32.gmra.mxu0 %vm586_vm12, %v4135_v23  ;;  %2626 = vmatmul.msk.f32.gmra.mxu1 %vm650_vm14, %v4135_v23  ;;  %vm588_vm12 = vcmp.eq.s32.totalorder %v3264_v19, %v2564_v55  ;;  %vm652_vm14 = vcmp.eq.s32.totalorder %v3264_v19, %v636_v56 }
  0x94   : > { %2648 = vmatmul.msk.f32.gmra.mxu2 %vm822_vm1, %v3212_v2 }
  0x98   : > { %2611 = vmatmul.msk.f32.gmra.mxu0 %vm587_vm13, %v4135_v23  ;;  %2627 = vmatmul.msk.f32.gmra.mxu1 %vm651_vm15, %v4135_v23  ;;  %vm589_vm13 = vcmp.eq.s32.totalorder %v3264_v19, %v2565_v58  ;;  %vm653_vm15 = vcmp.eq.s32.totalorder %v3264_v19, %v637_v59 }
  0x9c   : > { %2649 = vmatmul.msk.f32.gmra.mxu2 %vm822_vm1, %v3207_v1  ;;  %v557_v1 = vadd.s32 112, %v3259_v16 }
  0x9e   : > { %v2567_v2 = vadd.s32 4294967295, %v557_v1  ;;  %v639_v3 = vadd.s32 1, %v557_v1 }
  0xa0   : > { %2612 = vmatmul.msk.f32.gmra.mxu0 %vm588_vm12, %v4135_v23  ;;  %2628 = vmatmul.msk.f32.gmra.mxu1 %vm652_vm14, %v4135_v23  ;;  %vm590_vm12 = vcmp.eq.s32.totalorder %v3264_v19, %v2566_v62  ;;  %vm654_vm14 = vcmp.eq.s32.totalorder %v3264_v19, %v638_v63  ;;  %vm591_vm0 = vcmp.eq.s32.totalorder %v3264_v19, %v2567_v2 }
  0xa4   : > { %2650 = vmatmul.msk.f32.gmra.mxu2 %vm822_vm1, %v3204_v0  ;;  %v558_v0 = vadd.s32 120, %v3259_v16 }
  0xa6   : > { %v2568_v5 = vadd.s32 4294967295, %v558_v0  ;;  %v640_v6 = vadd.s32 1, %v558_v0 }
  0xa8   : > { %2613 = vmatmul.msk.f32.gmra.mxu0 %vm589_vm13, %v4135_v23  ;;  %2629 = vmatmul.msk.f32.gmra.mxu1 %vm653_vm15, %v4135_v23  ;;  %vm655_vm13 = vcmp.eq.s32.totalorder %v3264_v19, %v639_v3  ;;  %vm592_vm15 = vcmp.eq.s32.totalorder %v3264_v19, %v2568_v5 }
  0xaf   : > { %v3492_v4 = vpop.f32.mrf.mxu2 }
  0xb0   : > { %2614 = vmatmul.msk.f32.gmra.mxu0 %vm590_vm12, %v4135_v23  ;;  %2630 = vmatmul.msk.f32.gmra.mxu1 %vm654_vm14, %v4135_v23  ;;  %vm656_vm12 = vcmp.eq.s32.totalorder %v3264_v19, %v640_v6 }
  0xb7   : > { %v3499_v7 = vpop.f32.mrf.mxu2 }
  0xb8   : > { %2615 = vmatmul.msk.f32.gmra.mxu0 %vm591_vm0, %v4135_v23  ;;  %2631 = vmatmul.msk.f32.gmra.mxu1 %vm655_vm13, %v4135_v23 }
  0xbf   : > { %v3505_v8 = vpop.f32.mrf.mxu2 }
  0xc0   : > { %2616 = vmatmul.msk.f32.gmra.mxu0 %vm592_vm15, %v4135_v23  ;;  %2632 = vmatmul.msk.f32.gmra.mxu1 %vm656_vm12, %v4135_v23 }
  0xc5   : > { %v706_v9 = vpop.f32.mrf.mxu0  ;;  %v771_v10 = vpop.f32.mrf.mxu1 }
  0xc6   : > { %2652 = vmatmul.msk.f32.vlgmr.msra.gmra.mxu3 %vm822_vm1, %v706_v9  ;;  %2670 = vmatmul.msk.f32.vlgmr.msrb.gmra.mxu2 %vm822_vm1, %v771_v10 }
  0xc7   : > { %v3509_v11 = vpop.f32.mrf.mxu2 }
  0xcd   : > { %v709_v12 = vpop.f32.mrf.mxu0  ;;  %v774_v13 = vpop.f32.mrf.mxu1 }
  0xce   : > { %2653 = vmatmul.msk.f32.gmra.mxu3 %vm822_vm1, %v709_v12  ;;  %2671 = vmatmul.msk.f32.gmra.mxu2 %vm822_vm1, %v774_v13 }
  0xcf   : > { %v3513_v14 = vpop.f32.mrf.mxu2 }
  0xd5   : > { %v712_v15 = vpop.f32.mrf.mxu0  ;;  %v777_v17 = vpop.f32.mrf.mxu1 }
  0xd6   : > { %2654 = vmatmul.msk.f32.gmra.mxu3 %vm822_vm1, %v712_v15  ;;  %2672 = vmatmul.msk.f32.gmra.mxu2 %vm822_vm1, %v777_v17 }
  0xd7   : > { %v3517_v18 = vpop.f32.mrf.mxu2 }
  0xdd   : > { %v715_v44 = vpop.f32.mrf.mxu0  ;;  %v780_v45 = vpop.f32.mrf.mxu1 }
  0xde   : > { %2655 = vmatmul.msk.f32.gmra.mxu3 %vm822_vm1, %v715_v44  ;;  %2673 = vmatmul.msk.f32.gmra.mxu2 %vm822_vm1, %v780_v45 }
  0xdf   : > { %v3521_v46 = vpop.f32.mrf.mxu2 }
  0xe5   : > { %v718_v47 = vpop.f32.mrf.mxu0  ;;  %v783_v48 = vpop.f32.mrf.mxu1 }
  0xe6   : > { %2656 = vmatmul.msk.f32.gmra.mxu3 %vm822_vm1, %v718_v47  ;;  %2674 = vmatmul.msk.f32.gmra.mxu2 %vm822_vm1, %v783_v48 }
  0xe7   : > { %v3527_v51 = vpop.f32.mrf.mxu2 }
  0xed   : > { %v721_v49 = vpop.f32.mrf.mxu0  ;;  %v786_v50 = vpop.f32.mrf.mxu1 }
  0xee   : > { %2657 = vmatmul.msk.f32.gmra.mxu3 %vm822_vm1, %v721_v49  ;;  %2675 = vmatmul.msk.f32.gmra.mxu2 %vm822_vm1, %v786_v50 }
  0xef   : > { %v3531_v54 = vpop.f32.mrf.mxu2 }
  0xf5   : > { %v724_v52 = vpop.f32.mrf.mxu0  ;;  %v789_v53 = vpop.f32.mrf.mxu1 }
  0xf6   : > { %2658 = vmatmul.msk.f32.gmra.mxu3 %vm822_vm1, %v724_v52  ;;  %2676 = vmatmul.msk.f32.gmra.mxu2 %vm822_vm1, %v789_v53 }
  0xf7   : > { %v3535_v57 = vpop.f32.mrf.mxu2 }
  0xfd   : > { %v727_v55 = vpop.f32.mrf.mxu0  ;;  %v792_v56 = vpop.f32.mrf.mxu1 }
  0xfe   : > { %2659 = vmatmul.msk.f32.gmra.mxu3 %vm822_vm1, %v727_v55  ;;  %2677 = vmatmul.msk.f32.gmra.mxu2 %vm822_vm1, %v792_v56 }
  0xff   : > { %v3539_v60 = vpop.f32.mrf.mxu2 }
 0x105   : > { %v730_v58 = vpop.f32.mrf.mxu0  ;;  %v795_v59 = vpop.f32.mrf.mxu1 }
 0x106   : > { %2660 = vmatmul.msk.f32.gmra.mxu3 %vm822_vm1, %v730_v58  ;;  %2678 = vmatmul.msk.f32.gmra.mxu2 %vm822_vm1, %v795_v59 }
 0x107   : > { %v925_v2 = vpop.f32.mrf.mxu2 }
 0x10d   : > { %v733_v61 = vpop.f32.mrf.mxu0  ;;  %v798_v62 = vpop.f32.mrf.mxu1 }
 0x10e   : > { %2661 = vmatmul.msk.f32.gmra.mxu3 %vm822_vm1, %v733_v61  ;;  %2679 = vmatmul.msk.f32.gmra.mxu2 %vm822_vm1, %v798_v62 }
 0x10f   : > { %v928_v5 = vpop.f32.mrf.mxu2 }
 0x115   : > { %v736_v63 = vpop.f32.mrf.mxu0  ;;  %v801_v1 = vpop.f32.mrf.mxu1 }
 0x116   : > { %2662 = vmatmul.msk.f32.gmra.mxu3 %vm822_vm1, %v736_v63  ;;  %2680 = vmatmul.msk.f32.gmra.mxu2 %vm822_vm1, %v801_v1 }
 0x117   : > { %v931_v10 = vpop.f32.mrf.mxu2 }
 0x11d   : > { %v739_v3 = vpop.f32.mrf.mxu0  ;;  %v804_v0 = vpop.f32.mrf.mxu1 }
 0x11e   : > { %2663 = vmatmul.msk.f32.gmra.mxu3 %vm822_vm1, %v739_v3  ;;  %2681 = vmatmul.msk.f32.gmra.mxu2 %vm822_vm1, %v804_v0 }
 0x11f   : > { %v934_v15 = vpop.f32.mrf.mxu2 }
 0x125   : > { %v742_v6 = vpop.f32.mrf.mxu0  ;;  %v807_v9 = vpop.f32.mrf.mxu1 }
 0x126   : > { %2664 = vmatmul.msk.f32.gmra.mxu3 %vm822_vm1, %v742_v6  ;;  %2682 = vmatmul.msk.f32.gmra.mxu2 %vm822_vm1, %v807_v9 }
 0x127   : > { %v937_v48 = vpop.f32.mrf.mxu2 }
 0x12d   : > { %v745_v12 = vpop.f32.mrf.mxu0  ;;  %v810_v13 = vpop.f32.mrf.mxu1 }
 0x12e   : > { %2665 = vmatmul.msk.f32.gmra.mxu3 %vm822_vm1, %v745_v12  ;;  %2683 = vmatmul.msk.f32.gmra.mxu2 %vm822_vm1, %v810_v13 }
 0x135   : > { %v748_v17 = vpop.f32.mrf.mxu0  ;;  %v813_v44 = vpop.f32.mrf.mxu1 }
 0x136   : > { %2666 = vmatmul.msk.f32.gmra.mxu3 %vm822_vm1, %v748_v17  ;;  %2684 = vmatmul.msk.f32.gmra.mxu2 %vm822_vm1, %v813_v44 }
 0x13d   : > { %v751_v45 = vpop.f32.mrf.mxu0  ;;  %v816_v47 = vpop.f32.mrf.mxu1 }
 0x13e   : > { %2667 = vmatmul.msk.f32.gmra.mxu3 %vm822_vm1, %v751_v45  ;;  %2685 = vmatmul.msk.f32.gmra.mxu2 %vm822_vm1, %v816_v47 }
 0x149   : > { %v3555_v49 = vpop.f32.mrf.mxu3  ;;  %v3557_v50 = vpop.f32.mrf.mxu2 }
 0x151   : > { %v3559_v52 = vpop.f32.mrf.mxu3  ;;  %v3561_v53 = vpop.f32.mrf.mxu2 }
 0x159   : > { %v3563_v55 = vpop.f32.mrf.mxu3  ;;  %v3565_v56 = vpop.f32.mrf.mxu2 }
 0x161   : > { %v3567_v58 = vpop.f32.mrf.mxu3  ;;  %v3569_v59 = vpop.f32.mrf.mxu2 }
 0x169   : > { %v3571_v61 = vpop.f32.mrf.mxu3  ;;  %v3573_v62 = vpop.f32.mrf.mxu2 }
 0x171   : > { %v1023_v63 = vpop.f32.mrf.mxu3  ;;  %v3575_v1 = vpop.f32.mrf.mxu2 }
 0x179   : > { %v1026_v3 = vpop.f32.mrf.mxu3  ;;  %v1144_v0 = vpop.f32.mrf.mxu2 }
 0x181   : > { %v1029_v6 = vpop.f32.mrf.mxu3  ;;  %v1147_v9 = vpop.f32.mrf.mxu2 }
 0x189   : > { %v1032_v12 = vpop.f32.mrf.mxu3  ;;  %v1150_v13 = vpop.f32.mrf.mxu2 }
 0x191   : > { %v1035_v17 = vpop.f32.mrf.mxu3  ;;  %v1153_v44 = vpop.f32.mrf.mxu2 }
 0x199   : > { %v1038_v45 = vpop.f32.mrf.mxu3  ;;  %v1156_v47 = vpop.f32.mrf.mxu2 }
 0x19a   : > { %v1039_v38 = vadd.f32 %v1038_v45, %v3539_v60 }
 0x1a1   : > { %v1041_v23 = vpop.f32.mrf.mxu3  ;;  %v1159_v42 = vpop.f32.mrf.mxu2 }
 0x1a2   : > { %v1042_v21 = vadd.f32 %v1041_v23, %v925_v2  ;;  %v1033_v23 = vadd.f32 %v1032_v12, %v3531_v54 }
 0x1a9   : > { %v1044_v43 = vpop.f32.mrf.mxu3  ;;  %v1162_v39 = vpop.f32.mrf.mxu2 }
 0x1aa   : > { %v1045_v31 = vadd.f32 %v1044_v43, %v928_v5  ;;  %v3590_v43 = vld [vmem:[%s4110_s3] ss:$0 sm:$0xff] }
 0x1ac   : > { %v1186_v35 = vadd.f32 %v1162_v39, %v1045_v31  ;;  %v1027_v39 = vadd.f32 %v1026_v3, %v3521_v46  ;;  %v1021_v46 = vadd.f32 %v3571_v61, %v3513_v14  ;;  %v1015_v61 = vadd.f32 %v3563_v55, %v3505_v8 }
 0x1ad   : > { %v1009_v55 = vadd.f32 %v3555_v49, %v3492_v4 }
 0x1ae   : > { %v1180_v2 = vadd.f32 %v1144_v0, %v1027_v39  ;;  %v1178_v0 = vadd.f32 %v3573_v62, %v1021_v46  ;;  %v1176_v62 = vadd.f32 %v3565_v56, %v1015_v61 }
 0x1af   : > { %v1174_v4 = vadd.f32 %v3557_v50, %v1009_v55 }
 0x1b0   : > { %v1196_v49 = vmul.f32 %v3580_v25, %v1176_v62 }
 0x1b1   : > { %v1047_v40 = vpop.f32.mrf.mxu3  ;;  %v1165_v36 = vpop.f32.mrf.mxu2 }
 0x1b2   : > { %v1048_v30 = vadd.f32 %v1047_v40, %v931_v10  ;;  %v1185_v40 = vadd.f32 %v1159_v42, %v1042_v21  ;;  %v1030_v21 = vadd.f32 %v1029_v6, %v3527_v51  ;;  %v1200_v6 = vmul.f32 %v3580_v25, %v1180_v2 }
 0x1b3   : > { %v1216_v50 = vadd.f32 %v3590_v43, %v1196_v49 }
 0x1b4   : > { %v1187_v20 = vadd.f32 %v1165_v36, %v1048_v30  ;;  %v1206_v30 = vmul.f32 %v3580_v25, %v1186_v35  ;;  %v1181_v54 = vadd.f32 %v1147_v9, %v1030_v21 }
 0x1b9   : > { %v1050_v37 = vpop.f32.mrf.mxu3  ;;  %v1168_v33 = vpop.f32.mrf.mxu2 }
 0x1ba   : > { %v1051_v34 = vadd.f32 %v1050_v37, %v934_v15  ;;  %v1036_v37 = vadd.f32 %v1035_v17, %v3535_v57  ;;  %v1198_v17 = vmul.f32 %v3580_v25, %v1178_v0 }
 0x1bc   : > { %v1188_v27 = vadd.f32 %v1168_v33, %v1051_v34  ;;  %v1207_v33 = vmul.f32 %v3580_v25, %v1187_v20  ;;  %v1183_v31 = vadd.f32 %v1153_v44, %v1036_v37  ;;  %v1205_v20 = vmul.f32 %v3580_v25, %v1185_v40 }
 0x1bd   : > { %v1218_v37 = vadd.f32 %v3590_v43, %v1198_v17 }
 0x1be   : > { %v1208_v32 = vmul.f32 %v3580_v25, %v1188_v27  ;;  %v1227_v36 = vadd.f32 %v3590_v43, %v1207_v33  ;;  %v1203_v51 = vmul.f32 %v3580_v25, %v1183_v31  ;;  %v1225_v60 = vadd.f32 %v3590_v43, %v1205_v20 }
 0x1c0   : > { %v1243_v57 = vmax.f32 %v1227_v36, 0.0  ;;  %v1241_v3 = vmax.f32 %v1225_v60, 0.0  ;;  %v1223_v14 = vadd.f32 %v3590_v43, %v1203_v51  ;;  %v4209_v60 = vld [vmem:[#allocation29_spill] sm:$0xff] }
 0x1c1   : > { %v1053_v28 = vpop.f32.mrf.mxu3  ;;  %v1171_v24 = vpop.f32.mrf.mxu2  ;;  %v1251_v46 = vmul.u32 2, %v4209_v60 }
 0x1c2   : > { %v1054_v41 = vadd.f32 %v1053_v28, %v937_v48  ;;  %v1184_v28 = vadd.f32 %v1156_v47, %v1039_v38  ;;  %v1226_v38 = vadd.f32 %v3590_v43, %v1206_v30 }
 0x1c3   : > { %v1283_v2 = vadd.s32 1, %v1251_v46  ;;  %vm1259_vm11 = vcmp.eq.s32.totalorder %v3264_v19, %v1251_v46  ;;  %v4226_v46 = vld [vmem:[#allocation31_spill] sm:$0xff] }
 0x1c4   : > { %v1189_v29 = vadd.f32 %v1171_v24, %v1054_v41  ;;  %v1228_v24 = vadd.f32 %v3590_v43, %v1208_v32  ;;  %v1182_v41 = vadd.f32 %v1150_v13, %v1033_v23  ;;  %v1204_v42 = vmul.f32 %v3580_v25, %v1184_v28 }
 0x1c5   : > { %v1024_v32 = vadd.f32 %v1023_v63, %v3517_v18  ;;  %v1242_v10 = vmax.f32 %v1226_v38, 0.0  ;;  %v1018_v18 = vadd.f32 %v3567_v58, %v3509_v11  ;;  %v1201_v63 = vmul.f32 %v3580_v25, %v1181_v54  ;;  %v4208_v54 = vld [vmem:[#allocation26_spill] sm:$0xff] }
 0x1c6   : > { %v1209_v34 = vmul.f32 %v3580_v25, %v1189_v29  ;;  %v1244_v35 = vmax.f32 %v1228_v24, 0.0  ;;  %v1202_v5 = vmul.f32 %v3580_v25, %v1182_v41  ;;  %v1224_v15 = vadd.f32 %v3590_v43, %v1204_v42  ;;  %v1944_v42 = vld [vmem:[#allocation2 + $0x38] sm:$0xff] }
 0x1c7   : > { %v1179_v48 = vadd.f32 %v3575_v1, %v1024_v32  ;;  %v1012_v58 = vadd.f32 %v3559_v52, %v3499_v7  ;;  %v1177_v1 = vadd.f32 %v3569_v59, %v1018_v18  ;;  %v1239_v13 = vmax.f32 %v1223_v14, 0.0  ;;  %v4211_v18 = vld [vmem:[#allocation35_spill] sm:$0xff]  ;;  %v2734_v14 = vld [vmem:[%s4111_s4 + $0x10] sm:$0xff] }
 0x1c8   : > { %v1229_v27 = vadd.f32 %v3590_v43, %v1209_v34  ;;  %v1240_v9 = vmax.f32 %v1224_v15, 0.0  ;;  %v1222_v11 = vadd.f32 %v3590_v43, %v1202_v5  ;;  %v1221_v8 = vadd.f32 %v3590_v43, %v1201_v63  ;;  %v4210_v5 = vld [vmem:[#allocation32_spill] sm:$0xff] }
 0x1c9   : > { %v1199_v12 = vmul.f32 %v3580_v25, %v1179_v48  ;;  %v1220_v7 = vadd.f32 %v3590_v43, %v1200_v6  ;;  %v1175_v52 = vadd.f32 %v3561_v53, %v1012_v58  ;;  %v1197_v59 = vmul.f32 %v3580_v25, %v1177_v1 }
 0x1ca   : > { %v1245_v29 = vmax.f32 %v1229_v27, 0.0  ;;  %v1238_v44 = vmax.f32 %v1222_v11, 0.0  ;;  %v1237_v45 = vmax.f32 %v1221_v8, 0.0  ;;  %v1194_v34 = vmul.f32 %v3580_v25, %v1174_v4 }
 0x1cb   : > { %v1219_v47 = vadd.f32 %v3590_v43, %v1199_v12  ;;  %v1236_v56 = vmax.f32 %v1220_v7, 0.0  ;;  %v1195_v40 = vmul.f32 %v3580_v25, %v1175_v52  ;;  %v1217_v33 = vadd.f32 %v3590_v43, %v1197_v59 }
 0x1cc   : > { %1310 = vmatpush.msrb.mxu3 %v1245_v29  ;;  %1351 = vmatpush.msrb.mxu0 %v1245_v29  ;;  %v1234_v23 = vmax.f32 %v1218_v37, 0.0  ;;  %v1246_v27 = vmul.u32 2, %v3259_v16  ;;  %v1232_v24 = vmax.f32 %v1216_v50, 0.0  ;;  %v1214_v21 = vadd.f32 %v3590_v43, %v1194_v34 }
 0x1cd   : > { %v1235_v53 = vmax.f32 %v1219_v47, 0.0  ;;  %v1233_v28 = vmax.f32 %v1217_v33, 0.0  ;;  %v1215_v30 = vadd.f32 %v3590_v43, %v1195_v40  ;;  %v1247_v16 = vmul.u32 2, %v3277_v22 }
 0x1ce   : > { %1311 = vmatpush.msrb.mxu3 %v1244_v35  ;;  %1352 = vmatpush.msrb.mxu0 %v1244_v35  ;;  %v3642_v31 = vadd.s32 1, %v1246_v27  ;;  %v1230_v20 = vmax.f32 %v1214_v21, 0.0  ;;  %vm3645_vm1 = vcmp.eq.s32.totalorder %v3264_v19, %v1246_v27  ;;  %v4200_v43 = vmov 1.0  }
 0x1cf   : > { %v1231_v25 = vmax.f32 %v1215_v30, 0.0  ;;  %v3659_v36 = vadd.s32 1, %v1247_v16  ;;  %vm3662_vm0 = vcmp.eq.s32.totalorder %v3264_v19, %v1247_v16  ;;  %v1248_v22 = vmul.u32 2, %v3299_v26  ;;  %v4205_v26 = vld [vmem:[#allocation23_spill] sm:$0xff] }
 0x1d0   : > { %1312 = vmatpush.msrb.mxu3 %v1243_v57  ;;  %1353 = vmatpush.msrb.mxu0 %v1243_v57  ;;  %vm4159_vm14 = vcmp.eq.s32.totalorder %v3264_v19, %v3642_v31  ;;  %v1249_v35 = vmul.u32 2, %v4205_v26  ;;  %v1250_v51 = vmul.u32 2, %v4208_v54  ;;  %vm1291_vm8 = vcmp.eq.s32.totalorder %v3264_v19, %v1283_v2  ;;  %v4220_v26 = vld [vmem:[#allocation24_spill] sm:$0xff] }
 0x1d1   : > { %vm4158_vm13 = vcmp.eq.s32.totalorder %v3264_v19, %v3659_v36  ;;  %v3676_v41 = vadd.s32 1, %v1248_v22  ;;  %vm3679_vm15 = vcmp.eq.s32.totalorder %v3264_v19, %v1248_v22  ;;  %v1253_v48 = vmul.u32 2, %v4211_v18  ;;  %v4222_v54 = vld [vmem:[#allocation28_spill] sm:$0xff] }
 0x1d2   : > { %1313 = vmatpush.msrb.mxu3 %v1242_v10  ;;  %1354 = vmatpush.msrb.mxu0 %v1242_v10  ;;  %v3693_v38 = vadd.s32 1, %v1249_v35  ;;  %v1282_v57 = vadd.s32 1, %v1250_v51  ;;  %v1252_v10 = vmul.u32 2, %v4210_v5  ;;  %v4228_v5 = vld [vmem:[#allocation30_spill] sm:$0xff] }
 0x1d3   : > { %vm4160_vm12 = vcmp.eq.s32.totalorder %v3264_v19, %v3676_v41  ;;  %v1285_v63 = vadd.s32 1, %v1253_v48 }
 0x1d4   : > { %1314 = vmatpush.msrb.mxu3 %v1241_v3  ;;  %1355 = vmatpush.msrb.mxu0 %v1241_v3  ;;  %vm1290_vm10 = vcmp.eq.s32.totalorder %v3264_v19, %v1282_v57  ;;  %v1284_v15 = vadd.s32 1, %v1252_v10  ;;  %v2735_v3 = vld [vmem:[%s4111_s4 + $0x18] sm:$0xff] }
 0x1d5   : > { %v4224_v57 = vld [vmem:[#allocation27_spill] sm:$0xff] }
 0x1d6   : > { %1315 = vmatpush.msrb.mxu3 %v1240_v9  ;;  %1356 = vmatpush.msrb.mxu0 %v1240_v9  ;;  %vm1292_vm9 = vcmp.eq.s32.totalorder %v3264_v19, %v1284_v15  ;;  %v4230_v15 = vld [vmem:[#allocation34_spill] sm:$0xff] }
 0x1d8   : > { %1316 = vmatpush.msrb.mxu3 %v1239_v13  ;;  %1357 = vmatpush.msrb.mxu0 %v1239_v13 }
 0x1da   : > { %1317 = vmatpush.msrb.mxu3 %v1238_v44  ;;  %1358 = vmatpush.msrb.mxu0 %v1238_v44 }
 0x1dc   : > { %1318 = vmatpush.msrb.mxu3 %v1237_v45  ;;  %1359 = vmatpush.msrb.mxu0 %v1237_v45 }
 0x1de   : > { %1319 = vmatpush.msrb.mxu3 %v1236_v56  ;;  %1360 = vmatpush.msrb.mxu0 %v1236_v56 }
 0x1e0   : > { %1320 = vmatpush.msrb.mxu3 %v1235_v53  ;;  %1361 = vmatpush.msrb.mxu0 %v1235_v53  ;;  %v3042_v53 = vmov 0.0  }
 0x1e1   : > { %v3747_v34 = vsel %vm577_vm2, 1.0, %v3042_v53  ;;  %v3753_v50 = vsel %vm641_vm3, 1.0, %v3042_v53  ;;  %v3763_v30 = vsel %vm642_vm5, 1.0, %v3042_v53  ;;  %v3785_v16 = vsel %vm579_vm6, 1.0, %v3042_v53 }
 0x1e2   : > { %1321 = vmatpush.msrb.mxu3 %v1234_v23  ;;  %1362 = vmatpush.msrb.mxu0 %v1234_v23  ;;  %vm4221_vm3 = vcmp.eq.s32.totalorder %v3264_v19, %v4220_v26  ;;  %vm4225_vm5 = vcmp.eq.s32.totalorder %v3264_v19, %v4224_v57  ;;  %vm4227_vm6 = vcmp.eq.s32.totalorder %v3264_v19, %v4226_v46  ;;  %v3899_v29 = vsel %vm3662_vm0, 1.0, %v3042_v53 }
 0x1e3   : > { %v2573_v60 = vsel %vm4225_vm5, 1.0, %v3042_v53  ;;  %v2590_v2 = vsel %vm4227_vm6, 1.0, %v3042_v53  ;;  %vm2448_vm5 = vcmp.eq.s32.totalorder %v3264_v19, 4  ;;  %vm2451_vm6 = vcmask 32768  }
 0x1e4   : > { %1322 = vmatpush.msrb.mxu3 %v1233_v28  ;;  %1363 = vmatpush.msrb.mxu0 %v1233_v28 }
 0x1e6   : > { %1323 = vmatpush.msrb.mxu3 %v1232_v24  ;;  %1364 = vmatpush.msrb.mxu0 %v1232_v24  ;;  %v3769_v24 = vsel %vm578_vm4, 1.0, %v3042_v53  ;;  %vm4223_vm4 = vcmp.eq.s32.totalorder %v3264_v19, %v4222_v54 }
 0x1e8   : > { %1324 = vmatpush.msrb.mxu3 %v1231_v25  ;;  %1365 = vmatpush.msrb.mxu0 %v1231_v25  ;;  %v3779_v25 = vsel %vm643_vm7, 1.0, %v3042_v53  ;;  %vm4229_vm7 = vcmp.eq.s32.totalorder %v3264_v19, %v4228_v5 }
 0x1ea   : > { %1325 = vmatpush.msrb.mxu3 %v1230_v20  ;;  %1366 = vmatpush.msrb.mxu0 %v1230_v20 }
 0x1eb   : > { %2702 = vmatmul.msk.f32.vlgmr.msrb.gmra.mxu3 %vm3645_vm1, %v4200_v43  ;;  %2710 = vmatmul.msk.f32.vlgmr.msrb.gmra.mxu0 %vm4159_vm14, %v4200_v43  ;;  %vm4164_vm14 = vcmp.eq.s32.totalorder %v3264_v19, %v3693_v38 }
 0x1ec   : > { %1575 = vmatpush.msra.mxu0 %v2735_v3  ;;  %v4234_v3 = vld [vmem:[#allocation37_spill] sm:$0xff] }
 0x1ee   : > { %1576 = vmatpush.msra.mxu0 %v2734_v14 }
 0x1f3   : > { %2703 = vmatmul.msk.f32.gmra.mxu3 %vm3662_vm0, %v4200_v43  ;;  %2711 = vmatmul.msk.f32.gmra.mxu0 %vm4158_vm13, %v4200_v43  ;;  %vm3696_vm13 = vcmp.eq.s32.totalorder %v3264_v19, %v1249_v35  ;;  %v3801_v35 = vsel %vm4221_vm3, 1.0, %v3042_v53  ;;  %vm4240_vm0 = vcmp.eq.s32.totalorder %v3264_v19, %v3676_v41  ;;  %vm4241_vm3 = vcmp.eq.s32.totalorder %v3264_v19, %v3693_v38  ;;  %v1943_v41 = vld [vmem:[#allocation2 + $0x30] sm:$0xff] }
 0x1f4   : > { %v2696_v39 = vsel %vm4240_vm0, 1.0, %v3042_v53 }
 0x1fb   : > { %2704 = vmatmul.msk.f32.gmra.mxu3 %vm3679_vm15, %v4200_v43  ;;  %2712 = vmatmul.msk.f32.gmra.mxu0 %vm4160_vm12, %v4200_v43  ;;  %vm1258_vm12 = vcmp.eq.s32.totalorder %v3264_v19, %v1250_v51  ;;  %v2589_v51 = vsel %vm4223_vm4, 1.0, %v3042_v53  ;;  %vm2434_vm4 = vcmp.eq.s32.totalorder %v3264_v19, 3 }
 0x203   : > { %2705 = vmatmul.msk.f32.gmra.mxu3 %vm3696_vm13, %v4200_v43  ;;  %2713 = vmatmul.msk.f32.gmra.mxu0 %vm4164_vm14, %v4200_v43  ;;  %vm1260_vm14 = vcmp.eq.s32.totalorder %v3264_v19, %v1252_v10  ;;  %v2574_v10 = vsel %vm4229_vm7, 1.0, %v3042_v53 }
 0x20b   : > { %2706 = vmatmul.msk.f32.gmra.mxu3 %vm1258_vm12, %v4200_v43  ;;  %2714 = vmatmul.msk.f32.gmra.mxu0 %vm1290_vm10, %v4200_v43  ;;  %vm1261_vm10 = vcmp.eq.s32.totalorder %v3264_v19, %v1253_v48  ;;  %vm1293_vm12 = vcmp.eq.s32.totalorder %v3264_v19, %v1285_v63  ;;  %v4232_v48 = vld [vmem:[#allocation33_spill] sm:$0xff] }
 0x213   : > { %2707 = vmatmul.msk.f32.gmra.mxu3 %vm1259_vm11, %v4200_v43  ;;  %2715 = vmatmul.msk.f32.gmra.mxu0 %vm1291_vm8, %v4200_v43  ;;  %vm1536_vm8 = vcmask 130048   ;;  %vm4231_vm11 = vcmp.eq.s32.totalorder %v3264_v19, %v4230_v15 }
 0x214   : > { %v2591_v18 = vsel %vm4231_vm11, 1.0, %v3042_v53 }
 0x21b   : > { %2708 = vmatmul.msk.f32.gmra.mxu3 %vm1260_vm14, %v4200_v43  ;;  %2716 = vmatmul.msk.f32.gmra.mxu0 %vm1292_vm9, %v4200_v43  ;;  %vm1400_vm9 = vcmask 523264   ;;  %vm4233_vm14 = vcmp.eq.s32.totalorder %v3264_v19, %v4232_v48 }
 0x21c   : > { %v2575_v63 = vsel %vm4233_vm14, 1.0, %v3042_v53 }
 0x223   : > { %2709 = vmatmul.msk.f32.gmra.mxu3 %vm1261_vm10, %v4200_v43  ;;  %2717 = vmatmul.msk.f32.gmra.mxu0 %vm1293_vm12, %v4200_v43  ;;  %v4218_v43 = vld [vmem:[#allocation25_spill] sm:$0xff]  ;;  %vm4235_vm10 = vcmp.eq.s32.totalorder %v3264_v19, %v4234_v3 }
 0x224   : > { %vm4219_vm2 = vcmp.eq.s32.totalorder %v3264_v19, %v4218_v43  ;;  %v2592_v14 = vsel %vm4235_vm10, 1.0, %v3042_v53 }
 0x225   : > { %v3795_v22 = vsel %vm4219_vm2, 1.0, %v3042_v53  ;;  %vm4238_vm2 = vcmp.eq.s32.totalorder %v3264_v19, %v3642_v31 }
 0x268   : > { %v1368_v61 = vpop.f32.mrf.mxu0 }
 0x26e   : > { %v1327_v0 = vpop.f32.mrf.mxu3 }
 0x26f   : > { %v1392_v6 = vmax.f32 %v1327_v0, %v1368_v61  ;;  %v4236_v61 = vld [vmem:[#allocation36_spill] sm:$0xff] }
 0x270   : > { %v1371_v9 = vpop.f32.mrf.mxu0  ;;  %vm4237_vm12 = vcmp.eq.s32.totalorder %v3264_v19, %v4236_v61 }
 0x271   : > { %2736 = vmatmul.msk.f32.vlgmr.msra.gmra.mxu0 %vm1536_vm8, %v1392_v6  ;;  %v2576_v0 = vsel %vm4237_vm12, 1.0, %v3042_v53 }
 0x276   : > { %v1330_v11 = vpop.f32.mrf.mxu3 }
 0x277   : > { %v1393_v58 = vmax.f32 %v1330_v11, %v1371_v9  ;;  %v1532_v9 = vld [vmem:[%s4111_s4 + $0x8] sm:$0xff]  ;;  %v1531_v11 = vld [vmem:[%s4111_s4] sm:$0xff] }
 0x278   : > { %v1374_v1 = vpop.f32.mrf.mxu0 }
 0x279   : > { %2737 = vmatmul.msk.f32.gmra.mxu0 %vm1536_vm8, %v1393_v58 }
 0x27e   : > { %v1333_v12 = vpop.f32.mrf.mxu3 }
 0x27f   : > { %v1394_v13 = vmax.f32 %v1333_v12, %v1374_v1 }
 0x280   : > { %v1377_v8 = vpop.f32.mrf.mxu0 }
 0x281   : > { %2738 = vmatmul.msk.f32.gmra.mxu0 %vm1536_vm8, %v1394_v13 }
 0x286   : > { %v1336_v55 = vpop.f32.mrf.mxu3 }
 0x287   : > { %v1395_v62 = vmax.f32 %v1336_v55, %v1377_v8 }
 0x288   : > { %v1380_v17 = vpop.f32.mrf.mxu0 }
 0x289   : > { %2739 = vmatmul.msk.f32.gmra.mxu0 %vm1536_vm8, %v1395_v62 }
 0x28e   : > { %v1339_v44 = vpop.f32.mrf.mxu3 }
 0x28f   : > { %v1396_v7 = vmax.f32 %v1339_v44, %v1380_v17 }
 0x290   : > { %v1383_v52 = vpop.f32.mrf.mxu0 }
 0x291   : > { %2740 = vmatmul.msk.f32.gmra.mxu0 %vm1536_vm8, %v1396_v7 }
 0x296   : > { %v1342_v59 = vpop.f32.mrf.mxu3 }
 0x297   : > { %v1397_v45 = vmax.f32 %v1342_v59, %v1383_v52 }
 0x298   : > { %v1386_v47 = vpop.f32.mrf.mxu0 }
 0x299   : > { %2741 = vmatmul.msk.f32.gmra.mxu0 %vm1536_vm8, %v1397_v45 }
 0x29e   : > { %v1345_v4 = vpop.f32.mrf.mxu3 }
 0x29f   : > { %v1398_v49 = vmax.f32 %v1345_v4, %v1386_v47 }
 0x2a0   : > { %v1389_v56 = vpop.f32.mrf.mxu0 }
 0x2a1   : > { %2742 = vmatmul.msk.f32.gmra.mxu0 %vm1536_vm8, %v1398_v49 }
 0x2a6   : > { %v1348_v37 = vpop.f32.mrf.mxu3 }
 0x2a7   : > { %v1399_v40 = vmax.f32 %v1348_v37, %v1389_v56 }
 0x2a9   : > { %1433 = vmatpush.msrb.mxu1 %v1399_v40  ;;  %1498 = vmatpush.msra.mxu3 %v1399_v40 }
 0x2aa   : > { %2743 = vmatmul.msk.f32.gmra.mxu0 %vm1536_vm8, %v1399_v40 }
 0x2ab   : > { %1434 = vmatpush.msrb.mxu1 %v1398_v49  ;;  %1499 = vmatpush.msra.mxu3 %v1398_v49 }
 0x2ad   : > { %1435 = vmatpush.msrb.mxu1 %v1397_v45  ;;  %1500 = vmatpush.msra.mxu3 %v1397_v45 }
 0x2af   : > { %1436 = vmatpush.msrb.mxu1 %v1396_v7  ;;  %1501 = vmatpush.msra.mxu3 %v1396_v7 }
 0x2b1   : > { %1437 = vmatpush.msrb.mxu1 %v1395_v62  ;;  %1502 = vmatpush.msra.mxu3 %v1395_v62 }
 0x2b3   : > { %1438 = vmatpush.msrb.mxu1 %v1394_v13  ;;  %1503 = vmatpush.msra.mxu3 %v1394_v13 }
 0x2b5   : > { %1439 = vmatpush.msrb.mxu1 %v1393_v58  ;;  %1504 = vmatpush.msra.mxu3 %v1393_v58  ;;  %v2752_v58 = vld [vmem:[%s4111_s4 + $0x20] sm:$0xff] }
 0x2b7   : > { %1440 = vmatpush.msrb.mxu1 %v1392_v6  ;;  %1505 = vmatpush.msra.mxu3 %v1392_v6  ;;  %v2753_v6 = vld [vmem:[%s4111_s4 + $0x28] sm:$0xff] }
 0x2b8   : > { %2718 = vmatmul.msk.f32.vlgmr.msrb.gmra.mxu1 %vm1400_vm9, %v3747_v34  ;;  %2726 = vmatmul.msk.f32.vlgmr.msra.gmra.mxu3 %vm1400_vm9, %v3753_v50 }
 0x2b9   : > { %1708 = vmatpush.msra.mxu2 %v2753_v6  ;;  %1640 = vmatpush.msra.mxu1 %v1532_v9 }
 0x2bb   : > { %1641 = vmatpush.msra.mxu1 %v1531_v11  ;;  %1709 = vmatpush.msra.mxu2 %v2752_v58  ;;  %v2899_v11 = vld [vmem:[%s4112_s5] ss:$0 sm:$0xff] }
 0x2c0   : > { %2719 = vmatmul.msk.f32.gmra.mxu1 %vm1400_vm9, %v3769_v24  ;;  %2727 = vmatmul.msk.f32.gmra.mxu3 %vm1400_vm9, %v3763_v30 }
 0x2c8   : > { %2720 = vmatmul.msk.f32.gmra.mxu1 %vm1400_vm9, %v3785_v16  ;;  %2728 = vmatmul.msk.f32.gmra.mxu3 %vm1400_vm9, %v3779_v25 }
 0x2d0   : > { %2721 = vmatmul.msk.f32.gmra.mxu1 %vm1400_vm9, %v3801_v35  ;;  %2729 = vmatmul.msk.f32.gmra.mxu3 %vm1400_vm9, %v3795_v22 }
 0x2d8   : > { %2722 = vmatmul.msk.f32.gmra.mxu1 %vm1400_vm9, %v2573_v60  ;;  %2730 = vmatmul.msk.f32.gmra.mxu3 %vm1400_vm9, %v2589_v51 }
 0x2e0   : > { %2723 = vmatmul.msk.f32.gmra.mxu1 %vm1400_vm9, %v2574_v10  ;;  %2731 = vmatmul.msk.f32.gmra.mxu3 %vm1400_vm9, %v2590_v2 }
 0x2e8   : > { %2724 = vmatmul.msk.f32.gmra.mxu1 %vm1400_vm9, %v2575_v63  ;;  %2732 = vmatmul.msk.f32.gmra.mxu3 %vm1400_vm9, %v2591_v18 }
 0x2ee   : > { %v1578_v37 = vpop.f32.mrf.mxu0 }
 0x2f0   : > { %2725 = vmatmul.msk.f32.gmra.mxu1 %vm1400_vm9, %v2576_v0  ;;  %2733 = vmatmul.msk.f32.gmra.mxu3 %vm1400_vm9, %v2592_v14 }
 0x2f6   : > { %v1581_v23 = vpop.f32.mrf.mxu0 }
 0x2fe   : > { %v1584_v20 = vpop.f32.mrf.mxu0 }
 0x306   : > { %v1587_v51 = vpop.f32.mrf.mxu0 }
 0x30e   : > { %v1590_v46 = vpop.f32.mrf.mxu0 }
 0x316   : > { %v1593_v15 = vpop.f32.mrf.mxu0 }
 0x31e   : > { %v1596_v63 = vpop.f32.mrf.mxu0 }
 0x327   : > { %v1599_v9 = vpop.f32.mrf.mxu0 }
 0x335   : > { %v1442_v1 = vpop.f32.mrf.mxu1 }
 0x336   : > { %2744 = vmatmul.msk.f32.vlgmr.msra.gmra.mxu1 %vm1536_vm8, %v1442_v1 }
 0x33b   : > { %v1507_v12 = vpop.f32.mrf.mxu3 }
 0x33c   : > { %2754 = vmatmul.msk.f32.vlgmr.msra.gmra.mxu2 %vm1536_vm8, %v1507_v12 }
 0x33d   : > { %v1445_v13 = vpop.f32.mrf.mxu1 }
 0x33e   : > { %2745 = vmatmul.msk.f32.gmra.mxu1 %vm1536_vm8, %v1445_v13 }
 0x343   : > { %v1510_v8 = vpop.f32.mrf.mxu3 }
 0x344   : > { %2755 = vmatmul.msk.f32.gmra.mxu2 %vm1536_vm8, %v1510_v8 }
 0x345   : > { %v1448_v55 = vpop.f32.mrf.mxu1 }
 0x346   : > { %2746 = vmatmul.msk.f32.gmra.mxu1 %vm1536_vm8, %v1448_v55 }
 0x34b   : > { %v1513_v62 = vpop.f32.mrf.mxu3 }
 0x34c   : > { %2756 = vmatmul.msk.f32.gmra.mxu2 %vm1536_vm8, %v1513_v62 }
 0x34d   : > { %v1451_v17 = vpop.f32.mrf.mxu1 }
 0x34e   : > { %2747 = vmatmul.msk.f32.gmra.mxu1 %vm1536_vm8, %v1451_v17 }
 0x353   : > { %v1516_v44 = vpop.f32.mrf.mxu3 }
 0x354   : > { %2757 = vmatmul.msk.f32.gmra.mxu2 %vm1536_vm8, %v1516_v44 }
 0x355   : > { %v1454_v7 = vpop.f32.mrf.mxu1 }
 0x356   : > { %2748 = vmatmul.msk.f32.gmra.mxu1 %vm1536_vm8, %v1454_v7 }
 0x35b   : > { %v1519_v52 = vpop.f32.mrf.mxu3 }
 0x35c   : > { %2758 = vmatmul.msk.f32.gmra.mxu2 %vm1536_vm8, %v1519_v52 }
 0x35d   : > { %v1457_v59 = vpop.f32.mrf.mxu1 }
 0x35e   : > { %2749 = vmatmul.msk.f32.gmra.mxu1 %vm1536_vm8, %v1457_v59 }
 0x363   : > { %v1522_v45 = vpop.f32.mrf.mxu3 }
 0x364   : > { %2759 = vmatmul.msk.f32.gmra.mxu2 %vm1536_vm8, %v1522_v45  ;;  %v2900_v45 = vld [vmem:[%s4113_s6] ss:$0 sm:$0xff] }
 0x365   : > { %v1460_v47 = vpop.f32.mrf.mxu1 }
 0x366   : > { %2750 = vmatmul.msk.f32.gmra.mxu1 %vm1536_vm8, %v1460_v47 }
 0x36b   : > { %v1525_v4 = vpop.f32.mrf.mxu3 }
 0x36c   : > { %2760 = vmatmul.msk.f32.gmra.mxu2 %vm1536_vm8, %v1525_v4 }
 0x36d   : > { %v1463_v49 = vpop.f32.mrf.mxu1 }
 0x36e   : > { %2751 = vmatmul.msk.f32.gmra.mxu1 %vm1536_vm8, %v1463_v49 }
 0x373   : > { %v1528_v56 = vpop.f32.mrf.mxu3 }
 0x374   : > { %2761 = vmatmul.msk.f32.gmra.mxu2 %vm1536_vm8, %v1528_v56 }
 0x3b3   : > { %v1643_v40 = vpop.f32.mrf.mxu1 }
 0x3b4   : > { %v1644_v33 = vadd.f32 %v1643_v40, %v1578_v37 }
 0x3bb   : > { %v1646_v28 = vpop.f32.mrf.mxu1 }
 0x3bc   : > { %v1647_v47 = vadd.f32 %v1646_v28, %v1581_v23 }
 0x3bf   : > { %v1711_v27 = vpop.f32.mrf.mxu2 }
 0x3c0   : > { %v1735_v21 = vadd.f32 %v1711_v27, %v1644_v33 }
 0x3c3   : > { %v1649_v43 = vpop.f32.mrf.mxu1 }
 0x3c4   : > { %v1650_v44 = vadd.f32 %v1649_v43, %v1584_v20 }
 0x3c7   : > { %v1714_v26 = vpop.f32.mrf.mxu2 }
 0x3c8   : > { %v1736_v40 = vadd.f32 %v1714_v26, %v1647_v47  ;;  %v2028_v47 = vld [vmem:[#allocation2 + $0x40] sm:$0xff] }
 0x3cb   : > { %v1652_v54 = vpop.f32.mrf.mxu1 }
 0x3cc   : > { %v1653_v8 = vadd.f32 %v1652_v54, %v1587_v51 }
 0x3cf   : > { %v1717_v57 = vpop.f32.mrf.mxu2 }
 0x3d0   : > { %v1737_v4 = vadd.f32 %v1717_v57, %v1650_v44  ;;  %v1937_v44 = vld [vmem:[#allocation2 + $0x8] sm:$0xff] }
 0x3d2   : > { %v1749_v51 = vmul.f32 %v2899_v11, %v1737_v4 }
 0x3d3   : > { %v1655_v60 = vpop.f32.mrf.mxu1 }
 0x3d4   : > { %v1656_v58 = vadd.f32 %v1655_v60, %v1590_v46  ;;  %v1748_v60 = vmul.f32 %v2899_v11, %v1736_v40  ;;  %v1761_v28 = vadd.f32 %v2900_v45, %v1749_v51 }
 0x3d6   : > { %v1760_v57 = vadd.f32 %v2900_v45, %v1748_v60 }
 0x3d7   : > { %v1720_v2 = vpop.f32.mrf.mxu2 }
 0x3d8   : > { %v1738_v7 = vadd.f32 %v1720_v2, %v1653_v8 }
 0x3da   : > { %v1750_v33 = vmul.f32 %v2899_v11, %v1738_v7  ;;  %v1936_v7 = vld [vmem:[#allocation2] sm:$0xff] }
 0x3db   : > { %v1658_v5 = vpop.f32.mrf.mxu1 }
 0x3dc   : > { %v1659_v0 = vadd.f32 %v1658_v5, %v1593_v15  ;;  %v1762_v2 = vadd.f32 %v2900_v45, %v1750_v33  ;;  %v1747_v5 = vmul.f32 %v2899_v11, %v1735_v21  ;;  %v3890_v21 = vsel %vm4238_vm2, 1.0, %v3042_v53 }
 0x3de   : > { %v1770_v26 = vmax.f32 %v1762_v2, 0.0  ;;  %v1759_v15 = vadd.f32 %v2900_v45, %v1747_v5 }
 0x3df   : > { %v1723_v10 = vpop.f32.mrf.mxu2 }
 0x3e0   : > { %v1739_v55 = vadd.f32 %v1723_v10, %v1656_v58  ;;  %v1769_v10 = vmax.f32 %v1761_v28, 0.0 }
 0x3e2   : > { %v1751_v49 = vmul.f32 %v2899_v11, %v1739_v55 }
 0x3e3   : > { %v1661_v48 = vpop.f32.mrf.mxu1 }
 0x3e4   : > { %v1662_v14 = vadd.f32 %v1661_v48, %v1596_v63  ;;  %v1763_v43 = vadd.f32 %v2900_v45, %v1751_v49  ;;  %v3884_v48 = vsel %vm3645_vm1, 1.0, %v3042_v53  ;;  %v1767_v63 = vmax.f32 %v1759_v15, 0.0 }
 0x3e5   : > { %vm4239_vm1 = vcmp.eq.s32.totalorder %v3264_v19, %v3659_v36  ;;  %v2689_v36 = vsel %vm3696_vm13, 1.0, %v3042_v53  ;;  %vm1861_vm13 = vcmask 261120  }
 0x3e6   : > { %v1771_v23 = vmax.f32 %v1763_v43, 0.0  ;;  %v3905_v31 = vsel %vm4239_vm1, 1.0, %v3042_v53 }
 0x3e7   : > { %v1726_v18 = vpop.f32.mrf.mxu2 }
 0x3e8   : > { %v1740_v1 = vadd.f32 %v1726_v18, %v1659_v0  ;;  %v1768_v18 = vmax.f32 %v1760_v57, 0.0  ;;  %v1941_v0 = vld [vmem:[#allocation2 + $0x20] sm:$0xff] }
 0x3ea   : > { %v1752_v52 = vmul.f32 %v2899_v11, %v1740_v1 }
 0x3eb   : > { %v1664_v61 = vpop.f32.mrf.mxu1 }
 0x3ec   : > { %v1665_v12 = vadd.f32 %v1664_v61, %v1599_v9  ;;  %v1764_v54 = vadd.f32 %v2900_v45, %v1752_v52  ;;  %v1942_v61 = vld [vmem:[#allocation2 + $0x28] sm:$0xff]  ;;  %v2031_v52 = vld [vmem:[#allocation2 + $0x58] sm:$0xff] }
 0x3ed   : > { %2056 = vmatpush.msrb.mxu2 %v2031_v52 }
 0x3ee   : > { %v1772_v46 = vmax.f32 %v1764_v54, 0.0 }
 0x3ef   : > { %v1729_v3 = vpop.f32.mrf.mxu2 }
 0x3f0   : > { %v1741_v6 = vadd.f32 %v1729_v3, %v1662_v14  ;;  %v2688_v3 = vsel %vm3679_vm15, 1.0, %v3042_v53  ;;  %v2697_v14 = vsel %vm4241_vm3, 1.0, %v3042_v53  ;;  %vm2392_vm15 = vcmp.eq.s32.totalorder %v3264_v19, 0 }
 0x3f2   : > { %v1753_v62 = vmul.f32 %v2899_v11, %v1741_v6 }
 0x3f4   : > { %v1765_v37 = vadd.f32 %v2900_v45, %v1753_v62  ;;  %v1939_v62 = vld [vmem:[#allocation2 + $0x18] sm:$0xff] }
 0x3f6   : > { %v1773_v20 = vmax.f32 %v1765_v37, 0.0 }
 0x3f7   : > { %v1732_v13 = vpop.f32.mrf.mxu2 }
 0x3f8   : > { %v1742_v17 = vadd.f32 %v1732_v13, %v1665_v12 }
 0x3fa   : > { %v1754_v59 = vmul.f32 %v2899_v11, %v1742_v17  ;;  %v1938_v17 = vld [vmem:[#allocation2 + $0x10] sm:$0xff] }
 0x3fc   : > { %v1766_v56 = vadd.f32 %v2900_v45, %v1754_v59  ;;  %v2030_v59 = vld [vmem:[#allocation2 + $0x50] sm:$0xff]  ;;  %v2029_v45 = vld [vmem:[#allocation2 + $0x48] sm:$0xff] }
 0x3fd   : > { %2057 = vmatpush.msrb.mxu2 %v2030_v59  ;;  %v2212_v59 = vld [vmem:[%s4117_s10 + $0x28] sm:$0xff] }
 0x3fe   : > { %v1774_v27 = vmax.f32 %v1766_v56, 0.0 }
 0x3ff   : > { %2058 = vmatpush.msrb.mxu2 %v2029_v45  ;;  %v2211_v45 = vld [vmem:[%s4117_s10 + $0x20] sm:$0xff] }
 0x400   : > { %1795 = vmatpush.msrb.mxu3 %v1774_v27  ;;  %1836 = vmatpush.msrb.mxu0 %v1774_v27 }
 0x401   : > { %2059 = vmatpush.msrb.mxu2 %v2028_v47  ;;  %v2210_v47 = vld [vmem:[%s4117_s10 + $0x18] sm:$0xff] }
 0x402   : > { %1796 = vmatpush.msrb.mxu3 %v1773_v20  ;;  %1837 = vmatpush.msrb.mxu0 %v1773_v20 }
 0x404   : > { %1797 = vmatpush.msrb.mxu3 %v1772_v46  ;;  %1838 = vmatpush.msrb.mxu0 %v1772_v46 }
 0x406   : > { %1798 = vmatpush.msrb.mxu3 %v1771_v23  ;;  %1839 = vmatpush.msrb.mxu0 %v1771_v23 }
 0x408   : > { %1799 = vmatpush.msrb.mxu3 %v1770_v26  ;;  %1840 = vmatpush.msrb.mxu0 %v1770_v26 }
 0x40a   : > { %1800 = vmatpush.msrb.mxu3 %v1769_v10  ;;  %1841 = vmatpush.msrb.mxu0 %v1769_v10  ;;  %v2901_v10 = vld [vmem:[%s4115_s8] ss:$0 sm:$0xff] }
 0x40c   : > { %1801 = vmatpush.msrb.mxu3 %v1768_v18  ;;  %1842 = vmatpush.msrb.mxu0 %v1768_v18 }
 0x40e   : > { %1802 = vmatpush.msrb.mxu3 %v1767_v63  ;;  %1843 = vmatpush.msrb.mxu0 %v1767_v63 }
 0x40f   : > { %2762 = vmatmul.msk.f32.vlgmr.msrb.gmra.mxu3 %vm1400_vm9, %v3884_v48  ;;  %2766 = vmatmul.msk.f32.vlgmr.msrb.gmra.mxu0 %vm1400_vm9, %v3890_v21 }
 0x410   : > { %1969 = vmatpush.msra.mxu0 %v1944_v42 }
 0x412   : > { %1970 = vmatpush.msra.mxu0 %v1943_v41  ;;  %v2902_v41 = vld [vmem:[%s4116_s9] ss:$0 sm:$0xff] }
 0x414   : > { %1971 = vmatpush.msra.mxu0 %v1942_v61 }
 0x416   : > { %1972 = vmatpush.msra.mxu0 %v1941_v0 }
 0x417   : > { %2763 = vmatmul.msk.f32.gmra.mxu3 %vm1400_vm9, %v3899_v29  ;;  %2767 = vmatmul.msk.f32.gmra.mxu0 %vm1400_vm9, %v3905_v31 }
 0x41f   : > { %2764 = vmatmul.msk.f32.gmra.mxu3 %vm1400_vm9, %v2688_v3  ;;  %2768 = vmatmul.msk.f32.gmra.mxu0 %vm1400_vm9, %v2696_v39 }
 0x427   : > { %2765 = vmatmul.msk.f32.gmra.mxu3 %vm1400_vm9, %v2689_v36  ;;  %2769 = vmatmul.msk.f32.gmra.mxu0 %vm1400_vm9, %v2697_v14 }
 0x48c   : > { %v1845_v6 = vpop.f32.mrf.mxu0 }
 0x492   : > { %v1804_v32 = vpop.f32.mrf.mxu3 }
 0x493   : > { %v1857_v9 = vmax.f32 %v1804_v32, %v1845_v6 }
 0x494   : > { %v1848_v11 = vpop.f32.mrf.mxu0 }
 0x495   : > { %2778 = vmatmul.msk.f32.vlgmr.msra.gmra.mxu0 %vm1861_vm13, %v1857_v9 }
 0x49a   : > { %v1807_v38 = vpop.f32.mrf.mxu3 }
 0x49b   : > { %v1858_v53 = vmax.f32 %v1807_v38, %v1848_v11 }
 0x49c   : > { %v1851_v58 = vpop.f32.mrf.mxu0 }
 0x49d   : > { %2779 = vmatmul.msk.f32.gmra.mxu0 %vm1861_vm13, %v1858_v53 }
 0x4a2   : > { %v1810_v1 = vpop.f32.mrf.mxu3 }
 0x4a3   : > { %v1859_v12 = vmax.f32 %v1810_v1, %v1851_v58  ;;  %v2805_v1 = vld [vmem:[%s4117_s10 + $0x78] sm:$0xff] }
 0x4a4   : > { %v1854_v13 = vpop.f32.mrf.mxu0  ;;  %2238 = vmatpush.msra.mxu2 %v2805_v1  ;;  %v2396_v1 = vld [vmem:[#allocation5 + $0x8] sm:$0xff] }
 0x4a5   : > { %2780 = vmatmul.msk.f32.gmra.mxu0 %vm1861_vm13, %v1859_v12 }
 0x4aa   : > { %v1813_v8 = vpop.f32.mrf.mxu3 }
 0x4ab   : > { %v1860_v55 = vmax.f32 %v1813_v8, %v1854_v13  ;;  %v2802_v13 = vld [vmem:[%s4117_s10 + $0x60] sm:$0xff]  ;;  %v2800_v8 = vld [vmem:[%s4117_s10 + $0x50] sm:$0xff] }
 0x4ad   : > { %1882 = vmatpush.msrb.mxu1 %v1860_v55  ;;  %1919 = vmatpush.msra.mxu3 %v1860_v55 }
 0x4ae   : > { %2781 = vmatmul.msk.f32.gmra.mxu0 %vm1861_vm13, %v1860_v55  ;;  %v2799_v55 = vld [vmem:[%s4117_s10 + $0x48] sm:$0xff] }
 0x4af   : > { %1883 = vmatpush.msrb.mxu1 %v1859_v12  ;;  %1920 = vmatpush.msra.mxu3 %v1859_v12  ;;  %v2804_v12 = vld [vmem:[%s4117_s10 + $0x70] sm:$0xff] }
 0x4b0   : > { %2239 = vmatpush.msra.mxu2 %v2804_v12  ;;  %v2424_v12 = vld [vmem:[#allocation5 + $0x18] sm:$0xff] }
 0x4b1   : > { %1884 = vmatpush.msrb.mxu1 %v1858_v53  ;;  %1921 = vmatpush.msra.mxu3 %v1858_v53 }
 0x4b3   : > { %1885 = vmatpush.msrb.mxu1 %v1857_v9  ;;  %1922 = vmatpush.msra.mxu3 %v1857_v9 }
 0x4b4   : > { %2770 = vmatmul.msk.f32.vlgmr.msrb.gmra.mxu1 %vm1861_vm13, %v3747_v34  ;;  %2774 = vmatmul.msk.f32.vlgmr.msra.gmra.mxu3 %vm1861_vm13, %v3753_v50 }
 0x4b5   : > { %2010 = vmatpush.msra.mxu1 %v1939_v62  ;;  %v2798_v62 = vld [vmem:[%s4117_s10 + $0x40] sm:$0xff] }
 0x4b7   : > { %2011 = vmatpush.msra.mxu1 %v1938_v17 }
 0x4b9   : > { %2012 = vmatpush.msra.mxu1 %v1937_v44  ;;  %v2214_v44 = vld [vmem:[%s4117_s10 + $0x38] sm:$0xff] }
 0x4bb   : > { %2013 = vmatpush.msra.mxu1 %v1936_v7  ;;  %v2213_v7 = vld [vmem:[%s4117_s10 + $0x30] sm:$0xff] }
 0x4bc   : > { %2771 = vmatmul.msk.f32.gmra.mxu1 %vm1861_vm13, %v3769_v24  ;;  %2775 = vmatmul.msk.f32.gmra.mxu3 %vm1861_vm13, %v3763_v30 }
 0x4c4   : > { %2772 = vmatmul.msk.f32.gmra.mxu1 %vm1861_vm13, %v3785_v16  ;;  %2776 = vmatmul.msk.f32.gmra.mxu3 %vm1861_vm13, %v3779_v25 }
 0x4cc   : > { %2773 = vmatmul.msk.f32.gmra.mxu1 %vm1861_vm13, %v3801_v35  ;;  %2777 = vmatmul.msk.f32.gmra.mxu3 %vm1861_vm13, %v3795_v22 }
 0x512   : > { %v1974_v33 = vpop.f32.mrf.mxu0 }
 0x51a   : > { %v1977_v51 = vpop.f32.mrf.mxu0 }
 0x522   : > { %v1980_v60 = vpop.f32.mrf.mxu0 }
 0x52b   : > { %v1983_v26 = vpop.f32.mrf.mxu0 }
 0x531   : > { %v1887_v16 = vpop.f32.mrf.mxu1 }
 0x532   : > { %2782 = vmatmul.msk.f32.vlgmr.msra.gmra.mxu1 %vm1861_vm13, %v1887_v16  ;;  %v2209_v16 = vld [vmem:[%s4117_s10 + $0x10] sm:$0xff] }
 0x537   : > { %v1924_v25 = vpop.f32.mrf.mxu3 }
 0x538   : > { %2786 = vmatmul.msk.f32.vlgmr.msrb.gmra.mxu2 %vm1861_vm13, %v1924_v25 }
 0x539   : > { %v1890_v35 = vpop.f32.mrf.mxu1 }
 0x53a   : > { %2783 = vmatmul.msk.f32.gmra.mxu1 %vm1861_vm13, %v1890_v35  ;;  %v2208_v35 = vld [vmem:[%s4117_s10 + $0x8] sm:$0xff] }
 0x53f   : > { %v1927_v22 = vpop.f32.mrf.mxu3 }
 0x540   : > { %2787 = vmatmul.msk.f32.gmra.mxu2 %vm1861_vm13, %v1927_v22 }
 0x541   : > { %v1893_v4 = vpop.f32.mrf.mxu1 }
 0x542   : > { %2784 = vmatmul.msk.f32.gmra.mxu1 %vm1861_vm13, %v1893_v4 }
 0x547   : > { %v1930_v49 = vpop.f32.mrf.mxu3 }
 0x548   : > { %2788 = vmatmul.msk.f32.gmra.mxu2 %vm1861_vm13, %v1930_v49 }
 0x549   : > { %v1896_v56 = vpop.f32.mrf.mxu1 }
 0x54a   : > { %2785 = vmatmul.msk.f32.gmra.mxu1 %vm1861_vm13, %v1896_v56  ;;  %v2817_v56 = vld [vmem:[%s4117_s10 + $0xb8] sm:$0xff] }
 0x54f   : > { %v1933_v37 = vpop.f32.mrf.mxu3 }
 0x550   : > { %2789 = vmatmul.msk.f32.gmra.mxu2 %vm1861_vm13, %v1933_v37  ;;  %v2816_v37 = vld [vmem:[%s4117_s10 + $0xb0] sm:$0xff] }
 0x5af   : > { %v2015_v40 = vpop.f32.mrf.mxu1 }
 0x5b0   : > { %v2016_v57 = vadd.f32 %v2015_v40, %v1974_v33  ;;  %v2815_v40 = vld [vmem:[%s4117_s10 + $0xa8] sm:$0xff]  ;;  %v2813_v33 = vld [vmem:[%s4117_s10 + $0x98] sm:$0xff] }
 0x5b7   : > { %v2018_v27 = vpop.f32.mrf.mxu1 }
 0x5b8   : > { %v2019_v23 = vadd.f32 %v2018_v27, %v1977_v51  ;;  %v2810_v27 = vld [vmem:[%s4117_s10 + $0x80] sm:$0xff] }
 0x5bb   : > { %v2061_v54 = vpop.f32.mrf.mxu2 }
 0x5bc   : > { %v2073_v3 = vadd.f32 %v2061_v54, %v2016_v57 }
 0x5be   : > { %v2081_v61 = vmul.f32 %v2901_v10, %v2073_v3  ;;  %v2904_v3 = vld [vmem:[%s4119_s12] ss:$0 sm:$0xff] }
 0x5bf   : > { %v2021_v43 = vpop.f32.mrf.mxu1 }
 0x5c0   : > { %v2022_v2 = vadd.f32 %v2021_v43, %v1980_v60  ;;  %v2089_v38 = vadd.f32 %v2902_v41, %v2081_v61 }
 0x5c2   : > { %v2093_v58 = vmax.f32 %v2089_v38, 0.0 }
 0x5c3   : > { %v2064_v20 = vpop.f32.mrf.mxu2 }
 0x5c4   : > { %v2074_v15 = vadd.f32 %v2064_v20, %v2019_v23 }
 0x5c6   : > { %v2082_v14 = vmul.f32 %v2901_v10, %v2074_v15 }
 0x5c7   : > { %v2024_v5 = vpop.f32.mrf.mxu1 }
 0x5c8   : > { %v2025_v18 = vadd.f32 %v2024_v5, %v1983_v26  ;;  %v2090_v9 = vadd.f32 %v2902_v41, %v2082_v14  ;;  %v2903_v26 = vld [vmem:[%s4118_s11] ss:$0 sm:$0xff] }
 0x5ca   : > { %v2094_v53 = vmax.f32 %v2090_v9, 0.0 }
 0x5cb   : > { %v2067_v46 = vpop.f32.mrf.mxu2 }
 0x5cc   : > { %v2075_v28 = vadd.f32 %v2067_v46, %v2022_v2 }
 0x5ce   : > { %v2083_v39 = vmul.f32 %v2901_v10, %v2075_v28 }
 0x5d0   : > { %v2091_v6 = vadd.f32 %v2902_v41, %v2083_v39 }
 0x5d2   : > { %v2095_v11 = vmax.f32 %v2091_v6, 0.0  ;;  %v2382_v6 = vld [vmem:[#allocation5] sm:$0xff] }
 0x5d3   : > { %v2070_v63 = vpop.f32.mrf.mxu2 }
 0x5d4   : > { %v2076_v36 = vadd.f32 %v2070_v63, %v2025_v18 }
 0x5d6   : > { %v2084_v42 = vmul.f32 %v2901_v10, %v2076_v36 }
 0x5d8   : > { %v2092_v0 = vadd.f32 %v2902_v41, %v2084_v42 }
 0x5da   : > { %v2096_v32 = vmax.f32 %v2092_v0, 0.0 }
 0x5dc   : > { %2113 = vmatpush.msrb.mxu3 %v2096_v32 }
 0x5de   : > { %2114 = vmatpush.msrb.mxu3 %v2095_v11 }
 0x5e0   : > { %2115 = vmatpush.msrb.mxu3 %v2094_v53 }
 0x5e2   : > { %2116 = vmatpush.msrb.mxu3 %v2093_v58 }
 0x5e3   : > { %2790 = vmatmul.msk.f32.vlgmr.msrb.gmra.mxu3 %vm1861_vm13, %v3884_v48 }
 0x5e4   : > { %2140 = vmatpush.msra.mxu3 %v2096_v32  ;;  %v2410_v32 = vld [vmem:[#allocation5 + $0x10] sm:$0xff] }
 0x5e6   : > { %2141 = vmatpush.msra.mxu3 %v2095_v11  ;;  %v2438_v11 = vld [vmem:[#allocation5 + $0x20] sm:$0xff] }
 0x5e8   : > { %2142 = vmatpush.msra.mxu3 %v2094_v53 }
 0x5ea   : > { %2143 = vmatpush.msra.mxu3 %v2093_v58 }
 0x5eb   : > { %2791 = vmatmul.msk.f32.gmra.mxu3 %vm1861_vm13, %v3899_v29  ;;  %v2803_v29 = vld [vmem:[%s4117_s10 + $0x68] sm:$0xff] }
 0x5ec   : > { %2240 = vmatpush.msra.mxu2 %v2803_v29  ;;  %2267 = vmatpush.msrb.mxu3 %v2214_v44 }
 0x5ee   : > { %2241 = vmatpush.msra.mxu2 %v2802_v13  ;;  %2268 = vmatpush.msrb.mxu3 %v2213_v7 }
 0x5f0   : > { %2269 = vmatpush.msrb.mxu3 %v2212_v59 }
 0x5f2   : > { %2270 = vmatpush.msrb.mxu3 %v2211_v45 }
 0x5f3   : > { %2792 = vmatmul.msk.f32.vlgmr.msra.gmra.mxu3 %vm1861_vm13, %v3890_v21 }
 0x5f4   : > { %2271 = vmatpush.msrb.mxu3 %v2210_v47 }
 0x5f6   : > { %2272 = vmatpush.msrb.mxu3 %v2209_v16 }
 0x5f8   : > { %2273 = vmatpush.msrb.mxu3 %v2208_v35 }
 0x5fb   : > { %2793 = vmatmul.msk.f32.gmra.mxu3 %vm1861_vm13, %v3905_v31  ;;  %v2801_v31 = vld [vmem:[%s4117_s10 + $0x58] sm:$0xff] }
 0x5fc   : > { %2242 = vmatpush.msra.mxu2 %v2801_v31 }
 0x5fe   : > { %2243 = vmatpush.msra.mxu2 %v2800_v8 }
 0x600   : > { %2244 = vmatpush.msra.mxu2 %v2799_v55 }
 0x602   : > { %2245 = vmatpush.msra.mxu2 %v2798_v62 }
 0x666   : > { %v2118_v17 = vpop.f32.mrf.mxu3 }
 0x66e   : > { %v2121_v52 = vpop.f32.mrf.mxu3 }
 0x676   : > { %v2145_v25 = vpop.f32.mrf.mxu3 }
 0x677   : > { %v2151_v22 = vmax.f32 %v2118_v17, %v2145_v25 }
 0x679   : > { %2806 = vmatmul.msk.f32.vlgmr.msra.gmra.mxu2 %vm1400_vm9, %v2151_v22 }
 0x67e   : > { %v2148_v4 = vpop.f32.mrf.mxu3 }
 0x67f   : > { %v2152_v49 = vmax.f32 %v2121_v52, %v2148_v4 }
 0x681   : > { %2171 = vmatpush.msrb.mxu0 %v2152_v49  ;;  %2198 = vmatpush.msrb.mxu1 %v2152_v49 }
 0x682   : > { %2807 = vmatmul.msk.f32.gmra.mxu2 %vm1400_vm9, %v2152_v49 }
 0x683   : > { %2172 = vmatpush.msrb.mxu0 %v2151_v22  ;;  %2199 = vmatpush.msrb.mxu1 %v2151_v22 }
 0x684   : > { %2794 = vmatmul.msk.f32.vlgmr.msrb.gmra.mxu0 %vm1536_vm8, %v3747_v34  ;;  %2796 = vmatmul.msk.f32.vlgmr.msrb.gmra.mxu1 %vm1536_vm8, %v3753_v50  ;;  %v2207_v34 = vld [vmem:[%s4117_s10] sm:$0xff] }
 0x685   : > { %2305 = vmatpush.msra.mxu0 %v2817_v56  ;;  %v2814_v50 = vld [vmem:[%s4117_s10 + $0xa0] sm:$0xff]  ;;  %2274 = vmatpush.msrb.mxu3 %v2207_v34 }
 0x687   : > { %2306 = vmatpush.msra.mxu0 %v2816_v37  ;;  %2825 = vmatpush.msra.mxu3 %v2817_v56 }
 0x689   : > { %2307 = vmatpush.msra.mxu0 %v2815_v40  ;;  %2826 = vmatpush.msra.mxu3 %v2816_v37 }
 0x68b   : > { %2308 = vmatpush.msra.mxu0 %v2814_v50  ;;  %2827 = vmatpush.msra.mxu3 %v2815_v40 }
 0x68c   : > { %2795 = vmatmul.msk.f32.gmra.mxu0 %vm1536_vm8, %v3769_v24  ;;  %2797 = vmatmul.msk.f32.gmra.mxu1 %vm1536_vm8, %v3763_v30  ;;  %v2812_v24 = vld [vmem:[%s4117_s10 + $0x90] sm:$0xff]  ;;  %v2811_v30 = vld [vmem:[%s4117_s10 + $0x88] sm:$0xff] }
 0x68d   : > { %2309 = vmatpush.msra.mxu0 %v2813_v33  ;;  %2828 = vmatpush.msra.mxu3 %v2814_v50 }
 0x68f   : > { %2310 = vmatpush.msra.mxu0 %v2812_v24  ;;  %2829 = vmatpush.msra.mxu3 %v2813_v33 }
 0x691   : > { %2311 = vmatpush.msra.mxu0 %v2811_v30  ;;  %2830 = vmatpush.msra.mxu3 %v2812_v24 }
 0x693   : > { %2312 = vmatpush.msra.mxu0 %v2810_v27  ;;  %2831 = vmatpush.msra.mxu3 %v2811_v30 }
 0x695   : > { %2832 = vmatpush.msra.mxu3 %v2810_v27 }
 0x6fc   : > { %v2247_v46 = vpop.f32.mrf.mxu2 }
 0x701   : > { %v2174_v54 = vpop.f32.mrf.mxu0  ;;  %v2201_v51 = vpop.f32.mrf.mxu1 }
 0x702   : > { %2808 = vmatmul.msk.f32.vlgmr.msrb.gmra.mxu3 %vm1400_vm9, %v2174_v54  ;;  %2818 = vmatmul.msk.f32.vlgmr.msra.gmra.mxu0 %vm1400_vm9, %v2201_v51  ;;  %v2381_v54 = vld [vmem:[%s4121_s14] sm:$0x1] }
 0x705   : > { %v2250_v57 = vpop.f32.mrf.mxu2 }
 0x709   : > { %v2177_v20 = vpop.f32.mrf.mxu0  ;;  %v2204_v43 = vpop.f32.mrf.mxu1 }
 0x70a   : > { %2809 = vmatmul.msk.f32.gmra.mxu3 %vm1400_vm9, %v2177_v20 }
 0x712   : > { %2819 = vmatmul.msk.f32.vlgmr.msra.gmra.mxu3 %vm1400_vm9, %v2204_v43  ;;  %vm2420_vm9 = vcmp.eq.s32.totalorder %v3264_v19, 2 }
 0x77f   : > { %v2314_v23 = vpop.f32.mrf.mxu0 }
 0x785   : > { %v2276_v60 = vpop.f32.mrf.mxu3 }
 0x786   : > { %v2277_v5 = vadd.f32 %v2276_v60, %v2247_v46 }
 0x788   : > { %v2320_v28 = vadd.f32 %v2314_v23, %v2277_v5 }
 0x78a   : > { %v2326_v18 = vmul.f32 %v2903_v26, %v2320_v28 }
 0x78c   : > { %v2332_v14 = vadd.f32 %v2904_v3, %v2326_v18 }
 0x78d   : > { %v2279_v2 = vpop.f32.mrf.mxu3 }
 0x78e   : > { %v2280_v10 = vadd.f32 %v2279_v2, %v2250_v57  ;;  %v2334_v41 = vmax.f32 %v2332_v14, 0.0 }
 0x795   : > { %v2317_v15 = vpop.f32.mrf.mxu3 }
 0x796   : > { %v2321_v63 = vadd.f32 %v2317_v15, %v2280_v10 }
 0x798   : > { %v2327_v39 = vmul.f32 %v2903_v26, %v2321_v63 }
 0x79a   : > { %v2333_v36 = vadd.f32 %v2904_v3, %v2327_v39 }
 0x79c   : > { %v2335_v42 = vmax.f32 %v2333_v36, 0.0 }
 0x79e   : > { %2352 = vmatpush.msra.mxu1 %v2335_v42  ;;  %2374 = vmatpush.msrb.mxu2 %v2335_v42 }
 0x7a0   : > { %2353 = vmatpush.msra.mxu1 %v2334_v41  ;;  %2375 = vmatpush.msrb.mxu2 %v2334_v41 }
 0x7a1   : > { %2821 = vmatmul.msk.f32.vlgmr.msrb.gmra.mxu2 %vm1536_vm8, %v3890_v21  ;;  %2820 = vmatmul.msk.f32.vlgmr.msra.gmra.mxu1 %vm1536_vm8, %v3884_v48  ;;  %vm2406_vm8 = vcmp.eq.s32.totalorder %v3264_v19, 1 }
 0x81e   : > { %v2355_v61 = vpop.f32.mrf.mxu1 }
 0x824   : > { %v2377_v0 = vpop.f32.mrf.mxu2 }
 0x825   : > { %v2380_v9 = vmax.f32 %v2355_v61, %v2377_v0 }
 0x827   : > { %v2383_v38 = vmul.f32 %v2382_v6, %v2380_v9  ;;  %v2411_v53 = vmul.f32 %v2410_v32, %v2380_v9  ;;  %v2439_v58 = vmul.f32 %v2438_v11, %v2380_v9  ;;  %v2397_v29 = vmul.f32 %v2396_v1, %v2380_v9 }
 0x828   : > { %v2425_v13 = vmul.f32 %v2424_v12, %v2380_v9 }
 0x829   : > { %2384 = vadd.xlane.f32.xlu0 %v2383_v38  ;;  %2412 = vadd.xlane.f32.xlu1 %v2411_v53 }
 0x82a   : > { %2440 = vadd.xlane.f32.xlu2 %v2439_v58 }
 0x831   : > { %2398 = vadd.xlane.f32.xlu0 %v2397_v29  ;;  %2426 = vadd.xlane.f32.xlu1 %v2425_v13 }
 0x89c   : > { %v2385_v21 = vpop.xlane.xlu0 %2384  ;;  %v2413_v48 = vpop.xlane.xlu1 %2412 }
 0x89d   : > { %v2386_v31 = vrot.slane %v2385_v21, 4  ;;  %v2414_v8 = vrot.slane %v2413_v48, 4  ;;  %v2441_v55 = vpop.xlane.xlu2 %2440 }
 0x89e   : > { %v2442_v44 = vrot.slane %v2441_v55, 4 }
 0x89f   : > { %v2387_v62 = vadd.f32 %v2386_v31, %v2385_v21  ;;  %v2415_v17 = vadd.f32 %v2414_v8, %v2413_v48 }
 0x8a0   : > { %v2443_v45 = vadd.f32 %v2442_v44, %v2441_v55 }
 0x8a1   : > { %v2388_v7 = vrot.slane %v2387_v62, 2  ;;  %v2416_v59 = vrot.slane %v2415_v17, 2 }
 0x8a2   : > { %v2444_v37 = vrot.slane %v2443_v45, 2 }
 0x8a3   : > { %v2389_v52 = vadd.f32 %v2388_v7, %v2387_v62  ;;  %v2417_v4 = vadd.f32 %v2416_v59, %v2415_v17 }
 0x8a4   : > { %v2399_v47 = vpop.xlane.xlu0 %2398  ;;  %v2427_v16 = vpop.xlane.xlu1 %2426  ;;  %v2445_v27 = vadd.f32 %v2444_v37, %v2443_v45 }
 0x8a5   : > { %v2390_v25 = vrot.slane %v2389_v52, 1  ;;  %v2400_v35 = vrot.slane %v2399_v47, 4  ;;  %v2428_v22 = vrot.slane %v2427_v16, 4  ;;  %v2418_v33 = vrot.slane %v2417_v4, 1 }
 0x8a6   : > { %v2446_v2 = vrot.slane %v2445_v27, 1 }
 0x8a7   : > { %v2401_v49 = vadd.f32 %v2400_v35, %v2399_v47  ;;  %v2429_v56 = vadd.f32 %v2428_v22, %v2427_v16  ;;  %v2391_v40 = vadd.f32 %v2390_v25, %v2389_v52  ;;  %v2419_v60 = vadd.f32 %v2418_v33, %v2417_v4 }
 0x8a8   : > { %v2447_v10 = vadd.f32 %v2446_v2, %v2445_v27 }
 0x8a9   : > { %v2402_v34 = vrot.slane %v2401_v49, 2  ;;  %v2430_v50 = vrot.slane %v2429_v56, 2  ;;  %v2393_v51 = vsel %vm2392_vm15, %v2391_v40, 0.0  ;;  %v2421_v57 = vsel %vm2420_vm9, %v2419_v60, 0.0 }
 0x8aa   : > { %v2394_v5 = vadd.f32 %v2393_v51, %v2381_v54  ;;  %v2449_v3 = vsel %vm2448_vm5, %v2447_v10, 0.0 }
 0x8ab   : > { %v2403_v24 = vadd.f32 %v2402_v34, %v2401_v49  ;;  %v2431_v30 = vadd.f32 %v2430_v50, %v2429_v56 }
 0x8ad   : > { %v2404_v20 = vrot.slane %v2403_v24, 1  ;;  %v2432_v43 = vrot.slane %v2431_v30, 1 }
 0x8af   : > { %v2405_v46 = vadd.f32 %v2404_v20, %v2403_v24  ;;  %v2433_v28 = vadd.f32 %v2432_v43, %v2431_v30 }
 0x8b1   : > { %v2407_v23 = vsel %vm2406_vm8, %v2405_v46, 0.0  ;;  %v2435_v18 = vsel %vm2434_vm4, %v2433_v28, 0.0 }
 0x8b2   : > { %v2408_v26 = vadd.f32 %v2407_v23, %v2394_v5 }
 0x8b4   : > { %v2422_v15 = vadd.f32 %v2421_v57, %v2408_v26 }
 0x8b6   : > { %v2436_v63 = vadd.f32 %v2435_v18, %v2422_v15 }
 0x8b8   : > { %v2450_v39 = vadd.f32 %v2449_v3, %v2436_v63 }
 0x8ba   : > { %2452 = vst.msk [vmem:[%s520_s25] sm:$0x1] %vm2451_vm6, %v2450_v39 }
 0x8bb   : > { %2992 = shalt.err (!%p2989_p8)
}
 0x8bc   : > { %2841 = dma.vmem_to_hbm [thread:$0]  (%p3161_p5), %s2465_s26, 16, %s2467_s16, %s2454_s20  }
 0x8bd PF: > { %s4242_s29 = sld [smem:[#allocation13_spill]] }
 0x8be   : > { %s4243_s23 = sld [smem:[#allocation11_spill]] }
 0x8c3   : > { %p2858_p9 = scmp.ge.s32.totalorder %s4242_s29, 2 }
 0x8c4   : > { %s2478_s0 = sand.u32 1, %s4243_s23  }
 0x8c5   : > { %p2851_p10 = pnand %p2858_p9, %p3165_p6  ;;  %s2479_s21 = scalar_lea.sflag [#allocation4], %s2478_s0 }
 0x8c7   : > { %p2852_p11 = pneg %p2851_p10 }
 0x8c9   : > { %3018 = dma.done.wait (%p2852_p11), %s2479_s21, 16  }
 0x8ca   : > { %3020 = vsyncadd (%p2852_p11), %s2479_s21, 4294967280  ;;  %s4245_s21 = sld [smem:[#allocation14_spill]]  ;;  %s4248_s18 = smov %s3027_s19 }
 0x8cb   : > { %s4246_s22 = sld [smem:[#allocation12_spill]] }
 0x8cc   : > { %s4247_s20 = sld [smem:[#allocation15_spill]] }
 0x8d0   : > { %p27_p12 = scmp.ge.s32.totalorder %s4245_s21, 4  }
 0x8d1   : > { %s4249_s19 = smov %s4246_s22 }
 0x8d2   :  { %29 = sbr.rel (!%p27_p12) target bundleno = 7 (0x7), region = 136 }
 0x8d7   :  { %2484 = vsyncpa [#allocation3], 1 }
 0x8d8   :  { %2486 = vsyncpa [#allocation3 + $0x1], 1 }
 0x8d9   :  { %2487 = vsyncpa [#allocation6], 1 }
 0x8da   :  { %2488 = vsyncpa [#allocation4], 1 }
 0x8db   :  { %2490 = vsyncpa [#allocation4 + $0x1], 1 }

</bundles_post_ra>
